<compile_context>
chip_gen: v6e
topology: v6e:2x2x1
jax: 0.10.0
libtpu: 0.0.40
codegen_flags: <defaults>
</compile_context>

<pallas_src>
import functools

import jax
import jax.numpy as jnp
from jax import lax
from jax.experimental import pallas as pl
from jax.experimental.pallas import tpu as pltpu


# ----------------------------------------------------------------------------
# Pallas kernel
# ----------------------------------------------------------------------------
def _conv_time_res_kernel(x_ref, time_ref,
                          w1b02_ref, w1cat_ref, w2b_ref, wtd_ref,
                          btd_ref, b1d_ref, g1d_ref, be1d_ref, m1_ref,
                          b2d_ref, g2d_ref, be2d_ref, m2_ref, bskd_ref,
                          out_ref, *, H, W, hid_dim, batch_per_step):
    eps = 1e-5
    f32 = jnp.float32
    bf16 = jnp.bfloat16
    Bc = batch_per_step
    M = Bc * H                       # batch folded into the matmul M dimension
    WH = W * hid_dim

    rows = lax.broadcasted_iota(jnp.int32, (M, 1), 0)

    def shifted(v, shift):
        # Row r of the result is v[r - shift] *within the same image*; zeros
        # flow in across each per-image H boundary.  jnp.roll lowers to a
        # sublane slice+concat (XLU/VPU work off the MXU critical path); the
        # wrap-around rows are covered by the same boundary mask.
        rolled = jnp.roll(v, shift, axis=0)
        if shift > 0:
            mask = (rows % H) >= shift
        else:
            mask = (rows % H) < (H + shift)
        return jnp.where(mask, rolled, jnp.zeros_like(rolled))

    def select_rows(per_image):
        # per_image: list of Bc (1, C) values -> value broadcastable per row
        # of the batch-stacked (M, C) activations.
        out = per_image[-1]
        for b in range(Bc - 2, -1, -1):
            out = jnp.where(rows < (b + 1) * H, per_image[b], out)
        return out

    def gn_silu(z, gamma, beta, memb_scaled):
        # GroupNorm + SiLU, statistics kept per image and fully in f32.
        # Per-image column sums (aligned row blocks) + one f32 stat matmul
        # against the 1/n-prescaled group-membership matrix.
        parts = []
        for b in range(Bc):
            zb = z[b * H:(b + 1) * H, :]
            parts.append(jnp.sum(zb, axis=0, keepdims=True))
            parts.append(jnp.sum(zb * zb, axis=0, keepdims=True))
        s = jnp.concatenate(parts, axis=0)                         # (2*Bc, C)
        gs = jnp.dot(s, memb_scaled, preferred_element_type=f32)   # mean/E[x^2]
        scales, shifts = [], []
        for b in range(Bc):
            mean = gs[2 * b:2 * b + 1, :]
            var = gs[2 * b + 1:2 * b + 2, :] - mean * mean
            sc = lax.rsqrt(var + eps) * gamma
            scales.append(sc)
            shifts.append(beta - mean * sc)
        y = z * select_rows(scales) + select_rows(shifts)
        return y * jax.nn.sigmoid(y)

    x = x_ref[...]                                                 # (M, W*Cin) f32

    # --- conv1 centre tap + 1x1 skip: shared LHS, N-concatenated bf16 weights
    rc = jnp.dot(x.astype(bf16), w1cat_ref[...], preferred_element_type=f32)
    z1 = rc[:, :WH]
    skip = rc[:, WH:] + bskd_ref[...]
    # --- conv1 outer taps: in-vreg shifted LHS, bf16 cast at the dot boundary
    z1 = z1 + jnp.dot(shifted(x, 1).astype(bf16), w1b02_ref[0],
                      preferred_element_type=f32)
    z1 = z1 + jnp.dot(shifted(x, -1).astype(bf16), w1b02_ref[1],
                      preferred_element_type=f32)
    z1 = z1 + b1d_ref[...]
    h1 = gn_silu(z1, g1d_ref[...], be1d_ref[...], m1_ref[...])

    # --- time embedding: SiLU -> Linear, one M=Bc dot for the whole chunk,
    #     then per-image row broadcast.
    t = time_ref[0]                                                # (Bc, Ctx)
    t = t * jax.nn.sigmoid(t)
    temb = jnp.dot(t.astype(bf16), wtd_ref[...], preferred_element_type=f32)
    temb = temb + btd_ref[...]
    h1 = h1 + select_rows([temb[b:b + 1, :] for b in range(Bc)])

    # --- conv2: all three taps straight from vregs (no scratch round trip)
    z2 = jnp.dot(h1.astype(bf16), w2b_ref[1], preferred_element_type=f32)
    z2 = z2 + jnp.dot(shifted(h1, 1).astype(bf16), w2b_ref[0],
                      preferred_element_type=f32)
    z2 = z2 + jnp.dot(shifted(h1, -1).astype(bf16), w2b_ref[2],
                      preferred_element_type=f32)
    z2 = z2 + b2d_ref[...]
    h2 = gn_silu(z2, g2d_ref[...], be2d_ref[...], m2_ref[...])

    # --- lane-dense, unmasked full-lane output store
    out_ref[...] = skip + h2


# ----------------------------------------------------------------------------
# Wrapper (layout, banded-weight construction, BlockSpecs)
# ----------------------------------------------------------------------------
def conv_time_res_forward(x_nchw, time, params, num_group, num_chunks=1):
    """ConvTimeRes forward.

    num_chunks splits the batch across grid steps: 1 (default) folds the whole
    batch into the matmul M dimension (best on single-TC v5e/v6e); 2 gives one
    chunk per TensorCore on v7x via the "parallel" grid axis, with the rest of
    the batch still folded into M inside each step.
    """
    w1, w2 = params["w1"], params["w2"]                     # HWIO
    Cin, Hid = w1.shape[2], w1.shape[3]
    Out = w2.shape[3]
    Ctx = params["wt"].shape[0]

    x = jnp.transpose(x_nchw, (0, 2, 3, 1)).astype(jnp.float32)   # NHWC
    B, H, W, _ = x.shape
    assert B % num_chunks == 0
    Bc = B // num_chunks

    # Batch folded into rows; no HBM-side padding (H halo handled in-kernel).
    x_rows = x.reshape(B * H, W * Cin)
    time3 = time.astype(jnp.float32).reshape(num_chunks, Bc, Ctx)

    f32, bf16 = jnp.float32, jnp.bfloat16
    eye = lambda k: jnp.eye(W, k=k, dtype=f32)

    def band(w_hwio):   # (3,3,Ci,Co) -> (3, W*Ci, W*Co); kx taps + W padding folded
        return jnp.stack(
            [sum(jnp.kron(eye(1 - kx), w_hwio[ky, kx]) for kx in range(3))
             for ky in range(3)], axis=0)

    def tile_lanes(v):  # (1, C) -> (1, W*C), channel-fastest tiling
        return jnp.tile(v.astype(f32), (1, W))

    def membership(C):  # (W*C, W*C) group membership, pre-scaled by 1/n
        gid = (jnp.arange(W * C) % C) // (C // num_group)
        m = (gid[:, None] == gid[None, :]).astype(f32)
        return m / float(H * W * (C // num_group))

    w1b = band(w1)                                                  # f32 bands
    w2b = band(w2).astype(bf16)                                     # (3, W*Hid, W*Out)
    wskd = jnp.kron(jnp.eye(W, dtype=f32), params["wskip"].astype(f32))
    # conv1 centre tap + skip share the same LHS -> N-concat their weights.
    w1cat = jnp.concatenate([w1b[1], wskd], axis=1).astype(bf16)    # (W*Cin, W*(Hid+Out))
    w1b02 = jnp.stack([w1b[0], w1b[2]], axis=0).astype(bf16)        # (2, W*Cin, W*Hid)
    wtd = jnp.tile(params["wt"].astype(f32), (1, W)).astype(bf16)   # (Ctx, W*Hid)

    operands = [
        x_rows, time3,
        w1b02, w1cat, w2b, wtd,
        tile_lanes(params["bt"]),
        tile_lanes(params["b1"]), tile_lanes(params["g1"]), tile_lanes(params["be1"]),
        membership(Hid),
        tile_lanes(params["b2"]), tile_lanes(params["g2"]), tile_lanes(params["be2"]),
        membership(Out),
        tile_lanes(params["bskip"]),
    ]

    def full_spec(arr):
        zeros = (0,) * arr.ndim
        return pl.BlockSpec(arr.shape, lambda c, _z=zeros: _z)

    in_specs = [
        pl.BlockSpec((Bc * H, W * Cin), lambda c: (c, 0)),
        pl.BlockSpec((1, Bc, Ctx), lambda c: (c, 0, 0)),
    ] + [full_spec(a) for a in operands[2:]]

    kernel = functools.partial(_conv_time_res_kernel, H=H, W=W,
                               hid_dim=Hid, batch_per_step=Bc)

    out_rows = pl.pallas_call(
        kernel,
        out_shape=jax.ShapeDtypeStruct((B * H, W * Out), jnp.float32),
        grid=(num_chunks,),
        in_specs=in_specs,
        out_specs=pl.BlockSpec((Bc * H, W * Out), lambda c: (c, 0)),
        compiler_params=pltpu.CompilerParams(
            # Chunks are independent: lets v7x's two TensorCores each take one
            # when num_chunks > 1; harmless for the default single step.
            dimension_semantics=("parallel",)),
    )(*operands)

    # (B*H, W*Out) -> NCHW
    return jnp.transpose(out_rows.reshape(B, H, W, Out), (0, 3, 1, 2))


# ----------------------------------------------------------------------------
# Pure-JAX reference (NHWC), mirrors the PyTorch forward exactly.
# mm_dtype=jnp.bfloat16 emulates the kernel's bf16-operand / f32-accumulate
# matmuls (operands rounded to bf16 at each matmul boundary, all else f32).
# ----------------------------------------------------------------------------
def ref_forward_nhwc(x, time, p, num_group, mm_dtype=None):
    def c(v):
        return v.astype(mm_dtype).astype(jnp.float32) if mm_dtype is not None else v

    def gn(h, gamma, beta, G):
        B, H, W, C = h.shape
        cg = C // G
        hg = h.reshape(B, H, W, G, cg)
        mean = hg.mean(axis=(1, 2, 4), keepdims=True)
        var = ((hg - mean) ** 2).mean(axis=(1, 2, 4), keepdims=True)
        hn = ((hg - mean) / jnp.sqrt(var + 1e-5)).reshape(B, H, W, C)
        return hn * gamma + beta

    silu = lambda v: v * jax.nn.sigmoid(v)
    dn = ("NHWC", "HWIO", "NHWC")
    pad = ((1, 1), (1, 1))

    h = lax.conv_general_dilated(c(x), c(p["w1"]), (1, 1), pad,
                                 dimension_numbers=dn) + p["b1"]
    h = silu(gn(h, p["g1"], p["be1"], num_group))
    temb = jnp.matmul(c(silu(time)), c(p["wt"])) + p["bt"]
    h = h + temb[:, None, None, :]
    h = lax.conv_general_dilated(c(h), c(p["w2"]), (1, 1), pad,
                                 dimension_numbers=dn) + p["b2"]
    h = silu(gn(h, p["g2"], p["be2"], num_group))
    skip = jnp.matmul(c(x), c(p["wskip"])) + p["bskip"]   # 1x1 conv == channel matmul
    return skip + h


# ----------------------------------------------------------------------------
# Main
# ----------------------------------------------------------------------------
if __name__ == "__main__":
    B, inp_dim, H, W = 2, 4, 16, 16
    out_dim, hid_dim, ctx_dim = 8, 8, 8          # defaults: hid=ctx=out
    num_group = 4

    key = jax.random.PRNGKey(0)
    ks = jax.random.split(key, 16)

    params = {
        # time_emb Linear: PyTorch weight (hid, ctx) -> pass transposed (ctx, hid)
        "wt": 0.1 * jax.random.normal(ks[0], (ctx_dim, hid_dim), jnp.float32),
        "bt": 0.1 * jax.random.normal(ks[1], (1, hid_dim), jnp.float32),
        # conv1 3x3: HWIO
        "w1": 0.1 * jax.random.normal(ks[2], (3, 3, inp_dim, hid_dim), jnp.float32),
        "b1": 0.1 * jax.random.normal(ks[3], (1, hid_dim), jnp.float32),
        "g1": 1.0 + 0.1 * jax.random.normal(ks[4], (1, hid_dim), jnp.float32),
        "be1": 0.1 * jax.random.normal(ks[5], (1, hid_dim), jnp.float32),
        # conv2 3x3: HWIO
        "w2": 0.1 * jax.random.normal(ks[6], (3, 3, hid_dim, out_dim), jnp.float32),
        "b2": 0.1 * jax.random.normal(ks[7], (1, out_dim), jnp.float32),
        "g2": 1.0 + 0.1 * jax.random.normal(ks[8], (1, out_dim), jnp.float32),
        "be2": 0.1 * jax.random.normal(ks[9], (1, out_dim), jnp.float32),
        # skip 1x1 conv (inp != out) as a channel matmul (Cin, Out)
        "wskip": 0.1 * jax.random.normal(ks[10], (inp_dim, out_dim), jnp.float32),
        "bskip": 0.1 * jax.random.normal(ks[11], (1, out_dim), jnp.float32),
    }

    x_nchw = jax.random.normal(ks[12], (B, inp_dim, H, W), jnp.float32)
    time = jax.random.normal(ks[13], (B, ctx_dim), jnp.float32)

    out = conv_time_res_forward(x_nchw, time, params, num_group)
    out = jax.block_until_ready(out)

    x_nhwc = jnp.transpose(x_nchw, (0, 2, 3, 1))
    with jax.default_matmul_precision("highest"):
        ref_bf = ref_forward_nhwc(x_nhwc, time, params, num_group,
                                  mm_dtype=jnp.bfloat16)
        ref_f32 = ref_forward_nhwc(x_nhwc, time, params, num_group)
    ref_bf = jnp.transpose(ref_bf, (0, 3, 1, 2))
    ref_f32 = jnp.transpose(ref_f32, (0, 3, 1, 2))

    assert out.shape == (B, out_dim, H, W)
    # Tight check: kernel vs a reference that emulates its bf16-operand /
    # f32-accumulate matmuls (same products, only accumulation order differs).
    assert jnp.max(jnp.abs(out - ref_bf)) < 2e-3
    # Loose sanity check of the bf16 quantization error vs the full-f32 model.
    assert jnp.max(jnp.abs(out - ref_f32)) < 5e-2

    print("KERNEL_OK")
</pallas_src>

<mosaic_0001>
module attributes {stable_mosaic.version = 11 : i64} {
  func.func @_conv_time_res_kernel(%arg0: i32, %arg1: memref<32x64xf32, #tpu.memory_space<vmem>>, %arg2: memref<1x2x8xf32, #tpu.memory_space<vmem>>, %arg3: memref<2x64x128xbf16, #tpu.memory_space<vmem>>, %arg4: memref<64x256xbf16, #tpu.memory_space<vmem>>, %arg5: memref<3x128x128xbf16, #tpu.memory_space<vmem>>, %arg6: memref<8x128xbf16, #tpu.memory_space<vmem>>, %arg7: memref<1x128xf32, #tpu.memory_space<vmem>>, %arg8: memref<1x128xf32, #tpu.memory_space<vmem>>, %arg9: memref<1x128xf32, #tpu.memory_space<vmem>>, %arg10: memref<1x128xf32, #tpu.memory_space<vmem>>, %arg11: memref<128x128xf32, #tpu.memory_space<vmem>>, %arg12: memref<1x128xf32, #tpu.memory_space<vmem>>, %arg13: memref<1x128xf32, #tpu.memory_space<vmem>>, %arg14: memref<1x128xf32, #tpu.memory_space<vmem>>, %arg15: memref<128x128xf32, #tpu.memory_space<vmem>>, %arg16: memref<1x128xf32, #tpu.memory_space<vmem>>, %arg17: memref<32x128xf32, #tpu.memory_space<vmem>>) attributes {dimension_semantics = [#tpu.dimension_semantics<parallel>], iteration_bounds = array<i64: 1>, scalar_prefetch = 0 : i64, scratch_operands = 0 : i64, tpu.core_type = #tpu.core_type<tc>, window_params = [{transform_indices = @transform_0, window_bounds = array<i64: 32, 64>}, {transform_indices = @transform_1, window_bounds = array<i64: 1, 2, 8>}, {pipeline_mode = #tpu.pipeline_mode<synchronous>, transform_indices = @transform_2, window_bounds = array<i64: 2, 64, 128>}, {pipeline_mode = #tpu.pipeline_mode<synchronous>, transform_indices = @transform_3, window_bounds = array<i64: 64, 256>}, {pipeline_mode = #tpu.pipeline_mode<synchronous>, transform_indices = @transform_4, window_bounds = array<i64: 3, 128, 128>}, {pipeline_mode = #tpu.pipeline_mode<synchronous>, transform_indices = @transform_5, window_bounds = array<i64: 8, 128>}, {pipeline_mode = #tpu.pipeline_mode<synchronous>, transform_indices = @transform_6, window_bounds = array<i64: 1, 128>}, {pipeline_mode = #tpu.pipeline_mode<synchronous>, transform_indices = @transform_7, window_bounds = array<i64: 1, 128>}, {pipeline_mode = #tpu.pipeline_mode<synchronous>, transform_indices = @transform_8, window_bounds = array<i64: 1, 128>}, {pipeline_mode = #tpu.pipeline_mode<synchronous>, transform_indices = @transform_9, window_bounds = array<i64: 1, 128>}, {pipeline_mode = #tpu.pipeline_mode<synchronous>, transform_indices = @transform_10, window_bounds = array<i64: 128, 128>}, {pipeline_mode = #tpu.pipeline_mode<synchronous>, transform_indices = @transform_11, window_bounds = array<i64: 1, 128>}, {pipeline_mode = #tpu.pipeline_mode<synchronous>, transform_indices = @transform_12, window_bounds = array<i64: 1, 128>}, {pipeline_mode = #tpu.pipeline_mode<synchronous>, transform_indices = @transform_13, window_bounds = array<i64: 1, 128>}, {pipeline_mode = #tpu.pipeline_mode<synchronous>, transform_indices = @transform_14, window_bounds = array<i64: 128, 128>}, {pipeline_mode = #tpu.pipeline_mode<synchronous>, transform_indices = @transform_15, window_bounds = array<i64: 1, 128>}, {transform_indices = @transform_16, window_bounds = array<i64: 32, 128>}]} {
    %0 = tpu.iota {dimensions = array<i32: 0>} : vector<32x1xi32>
    %c0 = arith.constant 0 : index
    %c0_0 = arith.constant 0 : index
    %1 = vector.load %arg1[%c0, %c0_0] : memref<32x64xf32, #tpu.memory_space<vmem>>, vector<32x64xf32>
    %2 = arith.truncf %1 : vector<32x64xf32> to vector<32x64xbf16>
    %c0_1 = arith.constant 0 : index
    %c0_2 = arith.constant 0 : index
    %3 = vector.load %arg4[%c0_1, %c0_2] : memref<64x256xbf16, #tpu.memory_space<vmem>>, vector<64x256xbf16>
    %cst = arith.constant dense<0.000000e+00> : vector<32x256xf32>
    %4 = tpu.matmul %2, %3, %cst {dimension_numbers = #tpu.dot_dimension_numbers<[1], [0], [0], [1], [0, 0, 1, 1], [], []>} : vector<32x64xbf16>, vector<64x256xbf16>, vector<32x256xf32> -> vector<32x256xf32>
    %5 = vector.extract_strided_slice %4 {offsets = [0, 0], sizes = [32, 128], strides = [1, 1]} : vector<32x256xf32> to vector<32x128xf32>
    %6 = vector.extract_strided_slice %4 {offsets = [0, 128], sizes = [32, 128], strides = [1, 1]} : vector<32x256xf32> to vector<32x128xf32>
    %c0_3 = arith.constant 0 : index
    %c0_4 = arith.constant 0 : index
    %7 = vector.load %arg16[%c0_3, %c0_4] : memref<1x128xf32, #tpu.memory_space<vmem>>, vector<1x128xf32>
    %8 = vector.broadcast %7 : vector<1x128xf32> to vector<32x128xf32>
    %9 = arith.addf %6, %8 : vector<32x128xf32>
    %10 = vector.extract_strided_slice %1 {offsets = [31, 0], sizes = [1, 64], strides = [1, 1]} : vector<32x64xf32> to vector<1x64xf32>
    %11 = vector.extract_strided_slice %1 {offsets = [0, 0], sizes = [31, 64], strides = [1, 1]} : vector<32x64xf32> to vector<31x64xf32>
    %12 = tpu.concatenate %10, %11 in 0 : vector<1x64xf32>, vector<31x64xf32> -> vector<32x64xf32>
    %c16_i32 = arith.constant 16 : i32
    %c0_i32 = arith.constant 0 : i32
    %13 = arith.cmpi eq, %c16_i32, %c0_i32 : i32
    %c1_i32 = arith.constant 1 : i32
    %14 = arith.select %13, %c1_i32, %c16_i32 : i32
    %15 = vector.broadcast %14 : i32 to vector<32x1xi32>
    %16 = arith.remsi %0, %15 : vector<32x1xi32>
    %c0_i32_5 = arith.constant 0 : i32
    %17 = vector.broadcast %c0_i32_5 : i32 to vector<32x1xi32>
    %18 = arith.cmpi ne, %16, %17 : vector<32x1xi32>
    %c0_i32_6 = arith.constant 0 : i32
    %19 = vector.broadcast %c0_i32_6 : i32 to vector<32x1xi32>
    %20 = arith.cmpi slt, %16, %19 : vector<32x1xi32>
    %c0_i32_7 = arith.constant 0 : i32
    %21 = arith.cmpi slt, %14, %c0_i32_7 : i32
    %22 = vector.broadcast %21 : i1 to vector<32x1xi1>
    %23 = vector.broadcast %22 : vector<32x1xi1> to vector<32x1xi1>
    %24 = arith.xori %20, %23 : vector<32x1xi1>
    %25 = arith.andi %24, %18 : vector<32x1xi1>
    %26 = vector.broadcast %14 : i32 to vector<32x1xi32>
    %27 = arith.addi %16, %26 : vector<32x1xi32>
    %28 = arith.select %25, %27, %16 : vector<32x1xi1>, vector<32x1xi32>
    %c1_i32_8 = arith.constant 1 : i32
    %29 = vector.broadcast %c1_i32_8 : i32 to vector<32x1xi32>
    %30 = arith.cmpi sge, %28, %29 : vector<32x1xi32>
    %cst_9 = arith.constant 0.000000e+00 : f32
    %31 = vector.broadcast %cst_9 : f32 to vector<32x64xf32>
    %32 = vector.shape_cast %30 : vector<32x1xi1> to vector<32x1xi1>
    %33 = vector.broadcast %32 : vector<32x1xi1> to vector<32x64xi1>
    %34 = arith.select %33, %12, %31 : vector<32x64xi1>, vector<32x64xf32>
    %35 = arith.truncf %34 : vector<32x64xf32> to vector<32x64xbf16>
    %c0_10 = arith.constant 0 : index
    %c0_11 = arith.constant 0 : index
    %c0_12 = arith.constant 0 : index
    %36 = vector.load %arg3[%c0_10, %c0_11, %c0_12] : memref<2x64x128xbf16, #tpu.memory_space<vmem>>, vector<1x64x128xbf16>
    %37 = vector.shape_cast %36 : vector<1x64x128xbf16> to vector<64x128xbf16>
    %cst_13 = arith.constant dense<0.000000e+00> : vector<32x128xf32>
    %38 = tpu.matmul %35, %37, %cst_13 {dimension_numbers = #tpu.dot_dimension_numbers<[1], [0], [0], [1], [0, 0, 1, 1], [], []>} : vector<32x64xbf16>, vector<64x128xbf16>, vector<32x128xf32> -> vector<32x128xf32>
    %39 = arith.addf %5, %38 : vector<32x128xf32>
    %40 = vector.extract_strided_slice %1 {offsets = [1, 0], sizes = [31, 64], strides = [1, 1]} : vector<32x64xf32> to vector<31x64xf32>
    %41 = vector.extract_strided_slice %1 {offsets = [0, 0], sizes = [1, 64], strides = [1, 1]} : vector<32x64xf32> to vector<1x64xf32>
    %42 = tpu.concatenate %40, %41 in 0 : vector<31x64xf32>, vector<1x64xf32> -> vector<32x64xf32>
    %c16_i32_14 = arith.constant 16 : i32
    %c0_i32_15 = arith.constant 0 : i32
    %43 = arith.cmpi eq, %c16_i32_14, %c0_i32_15 : i32
    %c1_i32_16 = arith.constant 1 : i32
    %44 = arith.select %43, %c1_i32_16, %c16_i32_14 : i32
    %45 = vector.broadcast %44 : i32 to vector<32x1xi32>
    %46 = arith.remsi %0, %45 : vector<32x1xi32>
    %c0_i32_17 = arith.constant 0 : i32
    %47 = vector.broadcast %c0_i32_17 : i32 to vector<32x1xi32>
    %48 = arith.cmpi ne, %46, %47 : vector<32x1xi32>
    %c0_i32_18 = arith.constant 0 : i32
    %49 = vector.broadcast %c0_i32_18 : i32 to vector<32x1xi32>
    %50 = arith.cmpi slt, %46, %49 : vector<32x1xi32>
    %c0_i32_19 = arith.constant 0 : i32
    %51 = arith.cmpi slt, %44, %c0_i32_19 : i32
    %52 = vector.broadcast %51 : i1 to vector<32x1xi1>
    %53 = vector.broadcast %52 : vector<32x1xi1> to vector<32x1xi1>
    %54 = arith.xori %50, %53 : vector<32x1xi1>
    %55 = arith.andi %54, %48 : vector<32x1xi1>
    %56 = vector.broadcast %44 : i32 to vector<32x1xi32>
    %57 = arith.addi %46, %56 : vector<32x1xi32>
    %58 = arith.select %55, %57, %46 : vector<32x1xi1>, vector<32x1xi32>
    %c15_i32 = arith.constant 15 : i32
    %59 = vector.broadcast %c15_i32 : i32 to vector<32x1xi32>
    %60 = arith.cmpi slt, %58, %59 : vector<32x1xi32>
    %cst_20 = arith.constant 0.000000e+00 : f32
    %61 = vector.broadcast %cst_20 : f32 to vector<32x64xf32>
    %62 = vector.shape_cast %60 : vector<32x1xi1> to vector<32x1xi1>
    %63 = vector.broadcast %62 : vector<32x1xi1> to vector<32x64xi1>
    %64 = arith.select %63, %42, %61 : vector<32x64xi1>, vector<32x64xf32>
    %65 = arith.truncf %64 : vector<32x64xf32> to vector<32x64xbf16>
    %c1 = arith.constant 1 : index
    %c0_21 = arith.constant 0 : index
    %c0_22 = arith.constant 0 : index
    %66 = vector.load %arg3[%c1, %c0_21, %c0_22] : memref<2x64x128xbf16, #tpu.memory_space<vmem>>, vector<1x64x128xbf16>
    %67 = vector.shape_cast %66 : vector<1x64x128xbf16> to vector<64x128xbf16>
    %cst_23 = arith.constant dense<0.000000e+00> : vector<32x128xf32>
    %68 = tpu.matmul %65, %67, %cst_23 {dimension_numbers = #tpu.dot_dimension_numbers<[1], [0], [0], [1], [0, 0, 1, 1], [], []>} : vector<32x64xbf16>, vector<64x128xbf16>, vector<32x128xf32> -> vector<32x128xf32>
    %69 = arith.addf %39, %68 : vector<32x128xf32>
    %c0_24 = arith.constant 0 : index
    %c0_25 = arith.constant 0 : index
    %70 = vector.load %arg8[%c0_24, %c0_25] : memref<1x128xf32, #tpu.memory_space<vmem>>, vector<1x128xf32>
    %71 = vector.broadcast %70 : vector<1x128xf32> to vector<32x128xf32>
    %72 = arith.addf %69, %71 : vector<32x128xf32>
    %c0_26 = arith.constant 0 : index
    %c0_27 = arith.constant 0 : index
    %73 = vector.load %arg9[%c0_26, %c0_27] : memref<1x128xf32, #tpu.memory_space<vmem>>, vector<1x128xf32>
    %c0_28 = arith.constant 0 : index
    %c0_29 = arith.constant 0 : index
    %74 = vector.load %arg10[%c0_28, %c0_29] : memref<1x128xf32, #tpu.memory_space<vmem>>, vector<1x128xf32>
    %c0_30 = arith.constant 0 : index
    %c0_31 = arith.constant 0 : index
    %75 = vector.load %arg11[%c0_30, %c0_31] : memref<128x128xf32, #tpu.memory_space<vmem>>, vector<128x128xf32>
    %76 = vector.extract_strided_slice %72 {offsets = [0, 0], sizes = [16, 128], strides = [1, 1]} : vector<32x128xf32> to vector<16x128xf32>
    %cst_32 = arith.constant dense<0.000000e+00> : vector<128xf32>
    %77 = vector.multi_reduction <add>, %76, %cst_32 [0] : vector<16x128xf32> to vector<128xf32>
    %78 = vector.shape_cast %77 : vector<128xf32> to vector<1x128xf32>
    %79 = arith.mulf %76, %76 : vector<16x128xf32>
    %cst_33 = arith.constant dense<0.000000e+00> : vector<128xf32>
    %80 = vector.multi_reduction <add>, %79, %cst_33 [0] : vector<16x128xf32> to vector<128xf32>
    %81 = vector.shape_cast %80 : vector<128xf32> to vector<1x128xf32>
    %82 = vector.extract_strided_slice %72 {offsets = [16, 0], sizes = [16, 128], strides = [1, 1]} : vector<32x128xf32> to vector<16x128xf32>
    %cst_34 = arith.constant dense<0.000000e+00> : vector<128xf32>
    %83 = vector.multi_reduction <add>, %82, %cst_34 [0] : vector<16x128xf32> to vector<128xf32>
    %84 = vector.shape_cast %83 : vector<128xf32> to vector<1x128xf32>
    %85 = arith.mulf %82, %82 : vector<16x128xf32>
    %cst_35 = arith.constant dense<0.000000e+00> : vector<128xf32>
    %86 = vector.multi_reduction <add>, %85, %cst_35 [0] : vector<16x128xf32> to vector<128xf32>
    %87 = vector.shape_cast %86 : vector<128xf32> to vector<1x128xf32>
    %88 = tpu.concatenate %78, %81, %84, %87 in 0 : vector<1x128xf32>, vector<1x128xf32>, vector<1x128xf32>, vector<1x128xf32> -> vector<4x128xf32>
    %cst_36 = arith.constant dense<0.000000e+00> : vector<4x128xf32>
    %89 = tpu.matmul %88, %75, %cst_36 {dimension_numbers = #tpu.dot_dimension_numbers<[1], [0], [0], [1], [0, 0, 1, 1], [], []>} : vector<4x128xf32>, vector<128x128xf32>, vector<4x128xf32> -> vector<4x128xf32>
    %90 = vector.extract_strided_slice %89 {offsets = [0, 0], sizes = [1, 128], strides = [1, 1]} : vector<4x128xf32> to vector<1x128xf32>
    %91 = vector.extract_strided_slice %89 {offsets = [1, 0], sizes = [1, 128], strides = [1, 1]} : vector<4x128xf32> to vector<1x128xf32>
    %92 = arith.mulf %90, %90 : vector<1x128xf32>
    %93 = arith.subf %91, %92 : vector<1x128xf32>
    %cst_37 = arith.constant 9.99999974E-6 : f32
    %94 = vector.broadcast %cst_37 : f32 to vector<1x128xf32>
    %95 = arith.addf %93, %94 : vector<1x128xf32>
    %96 = math.rsqrt %95 : vector<1x128xf32>
    %97 = arith.mulf %96, %73 : vector<1x128xf32>
    %98 = arith.mulf %90, %97 : vector<1x128xf32>
    %99 = arith.subf %74, %98 : vector<1x128xf32>
    %100 = vector.extract_strided_slice %89 {offsets = [2, 0], sizes = [1, 128], strides = [1, 1]} : vector<4x128xf32> to vector<1x128xf32>
    %101 = vector.extract_strided_slice %89 {offsets = [3, 0], sizes = [1, 128], strides = [1, 1]} : vector<4x128xf32> to vector<1x128xf32>
    %102 = arith.mulf %100, %100 : vector<1x128xf32>
    %103 = arith.subf %101, %102 : vector<1x128xf32>
    %cst_38 = arith.constant 9.99999974E-6 : f32
    %104 = vector.broadcast %cst_38 : f32 to vector<1x128xf32>
    %105 = arith.addf %103, %104 : vector<1x128xf32>
    %106 = math.rsqrt %105 : vector<1x128xf32>
    %107 = arith.mulf %106, %73 : vector<1x128xf32>
    %108 = arith.mulf %100, %107 : vector<1x128xf32>
    %109 = arith.subf %74, %108 : vector<1x128xf32>
    %c16_i32_39 = arith.constant 16 : i32
    %110 = vector.broadcast %c16_i32_39 : i32 to vector<32x1xi32>
    %111 = arith.cmpi slt, %0, %110 : vector<32x1xi32>
    %112 = vector.shape_cast %111 : vector<32x1xi1> to vector<32x1xi1>
    %113 = vector.broadcast %112 : vector<32x1xi1> to vector<32x128xi1>
    %114 = vector.shape_cast %97 : vector<1x128xf32> to vector<1x128xf32>
    %115 = vector.broadcast %114 : vector<1x128xf32> to vector<32x128xf32>
    %116 = vector.shape_cast %107 : vector<1x128xf32> to vector<1x128xf32>
    %117 = vector.broadcast %116 : vector<1x128xf32> to vector<32x128xf32>
    %118 = arith.select %113, %115, %117 : vector<32x128xi1>, vector<32x128xf32>
    %119 = arith.mulf %72, %118 : vector<32x128xf32>
    %c16_i32_40 = arith.constant 16 : i32
    %120 = vector.broadcast %c16_i32_40 : i32 to vector<32x1xi32>
    %121 = arith.cmpi slt, %0, %120 : vector<32x1xi32>
    %122 = vector.shape_cast %121 : vector<32x1xi1> to vector<32x1xi1>
    %123 = vector.broadcast %122 : vector<32x1xi1> to vector<32x128xi1>
    %124 = vector.shape_cast %99 : vector<1x128xf32> to vector<1x128xf32>
    %125 = vector.broadcast %124 : vector<1x128xf32> to vector<32x128xf32>
    %126 = vector.shape_cast %109 : vector<1x128xf32> to vector<1x128xf32>
    %127 = vector.broadcast %126 : vector<1x128xf32> to vector<32x128xf32>
    %128 = arith.select %123, %125, %127 : vector<32x128xi1>, vector<32x128xf32>
    %129 = arith.addf %119, %128 : vector<32x128xf32>
    %130 = arith.negf %129 : vector<32x128xf32>
    %131 = math.exp %130 : vector<32x128xf32>
    %cst_41 = arith.constant 1.000000e+00 : f32
    %132 = vector.broadcast %cst_41 : f32 to vector<32x128xf32>
    %133 = arith.addf %132, %131 : vector<32x128xf32>
    %134 = arith.divf %132, %133 : vector<32x128xf32>
    %135 = arith.mulf %129, %134 : vector<32x128xf32>
    %c0_42 = arith.constant 0 : index
    %c0_43 = arith.constant 0 : index
    %c0_44 = arith.constant 0 : index
    %136 = vector.load %arg2[%c0_42, %c0_43, %c0_44] : memref<1x2x8xf32, #tpu.memory_space<vmem>>, vector<1x2x8xf32>
    %137 = vector.shape_cast %136 : vector<1x2x8xf32> to vector<2x8xf32>
    %138 = arith.negf %137 : vector<2x8xf32>
    %139 = math.exp %138 : vector<2x8xf32>
    %cst_45 = arith.constant 1.000000e+00 : f32
    %140 = vector.broadcast %cst_45 : f32 to vector<2x8xf32>
    %141 = arith.addf %140, %139 : vector<2x8xf32>
    %142 = arith.divf %140, %141 : vector<2x8xf32>
    %143 = arith.mulf %137, %142 : vector<2x8xf32>
    %144 = arith.truncf %143 : vector<2x8xf32> to vector<2x8xbf16>
    %c0_46 = arith.constant 0 : index
    %c0_47 = arith.constant 0 : index
    %145 = vector.load %arg6[%c0_46, %c0_47] : memref<8x128xbf16, #tpu.memory_space<vmem>>, vector<8x128xbf16>
    %cst_48 = arith.constant dense<0.000000e+00> : vector<2x128xf32>
    %146 = tpu.matmul %144, %145, %cst_48 {dimension_numbers = #tpu.dot_dimension_numbers<[1], [0], [0], [1], [0, 0, 1, 1], [], []>} : vector<2x8xbf16>, vector<8x128xbf16>, vector<2x128xf32> -> vector<2x128xf32>
    %c0_49 = arith.constant 0 : index
    %c0_50 = arith.constant 0 : index
    %147 = vector.load %arg7[%c0_49, %c0_50] : memref<1x128xf32, #tpu.memory_space<vmem>>, vector<1x128xf32>
    %148 = vector.broadcast %147 : vector<1x128xf32> to vector<2x128xf32>
    %149 = arith.addf %146, %148 : vector<2x128xf32>
    %150 = vector.extract_strided_slice %149 {offsets = [0, 0], sizes = [1, 128], strides = [1, 1]} : vector<2x128xf32> to vector<1x128xf32>
    %151 = vector.extract_strided_slice %149 {offsets = [1, 0], sizes = [1, 128], strides = [1, 1]} : vector<2x128xf32> to vector<1x128xf32>
    %c16_i32_51 = arith.constant 16 : i32
    %152 = vector.broadcast %c16_i32_51 : i32 to vector<32x1xi32>
    %153 = arith.cmpi slt, %0, %152 : vector<32x1xi32>
    %154 = vector.shape_cast %153 : vector<32x1xi1> to vector<32x1xi1>
    %155 = vector.broadcast %154 : vector<32x1xi1> to vector<32x128xi1>
    %156 = vector.shape_cast %150 : vector<1x128xf32> to vector<1x128xf32>
    %157 = vector.broadcast %156 : vector<1x128xf32> to vector<32x128xf32>
    %158 = vector.shape_cast %151 : vector<1x128xf32> to vector<1x128xf32>
    %159 = vector.broadcast %158 : vector<1x128xf32> to vector<32x128xf32>
    %160 = arith.select %155, %157, %159 : vector<32x128xi1>, vector<32x128xf32>
    %161 = arith.addf %135, %160 : vector<32x128xf32>
    %162 = arith.truncf %161 : vector<32x128xf32> to vector<32x128xbf16>
    %c1_52 = arith.constant 1 : index
    %c0_53 = arith.constant 0 : index
    %c0_54 = arith.constant 0 : index
    %163 = vector.load %arg5[%c1_52, %c0_53, %c0_54] : memref<3x128x128xbf16, #tpu.memory_space<vmem>>, vector<1x128x128xbf16>
    %164 = vector.shape_cast %163 : vector<1x128x128xbf16> to vector<128x128xbf16>
    %cst_55 = arith.constant dense<0.000000e+00> : vector<32x128xf32>
    %165 = tpu.matmul %162, %164, %cst_55 {dimension_numbers = #tpu.dot_dimension_numbers<[1], [0], [0], [1], [0, 0, 1, 1], [], []>} : vector<32x128xbf16>, vector<128x128xbf16>, vector<32x128xf32> -> vector<32x128xf32>
    %166 = vector.extract_strided_slice %161 {offsets = [31, 0], sizes = [1, 128], strides = [1, 1]} : vector<32x128xf32> to vector<1x128xf32>
    %167 = vector.extract_strided_slice %161 {offsets = [0, 0], sizes = [31, 128], strides = [1, 1]} : vector<32x128xf32> to vector<31x128xf32>
    %168 = tpu.concatenate %166, %167 in 0 : vector<1x128xf32>, vector<31x128xf32> -> vector<32x128xf32>
    %c16_i32_56 = arith.constant 16 : i32
    %c0_i32_57 = arith.constant 0 : i32
    %169 = arith.cmpi eq, %c16_i32_56, %c0_i32_57 : i32
    %c1_i32_58 = arith.constant 1 : i32
    %170 = arith.select %169, %c1_i32_58, %c16_i32_56 : i32
    %171 = vector.broadcast %170 : i32 to vector<32x1xi32>
    %172 = arith.remsi %0, %171 : vector<32x1xi32>
    %c0_i32_59 = arith.constant 0 : i32
    %173 = vector.broadcast %c0_i32_59 : i32 to vector<32x1xi32>
    %174 = arith.cmpi ne, %172, %173 : vector<32x1xi32>
    %c0_i32_60 = arith.constant 0 : i32
    %175 = vector.broadcast %c0_i32_60 : i32 to vector<32x1xi32>
    %176 = arith.cmpi slt, %172, %175 : vector<32x1xi32>
    %c0_i32_61 = arith.constant 0 : i32
    %177 = arith.cmpi slt, %170, %c0_i32_61 : i32
    %178 = vector.broadcast %177 : i1 to vector<32x1xi1>
    %179 = vector.broadcast %178 : vector<32x1xi1> to vector<32x1xi1>
    %180 = arith.xori %176, %179 : vector<32x1xi1>
    %181 = arith.andi %180, %174 : vector<32x1xi1>
    %182 = vector.broadcast %170 : i32 to vector<32x1xi32>
    %183 = arith.addi %172, %182 : vector<32x1xi32>
    %184 = arith.select %181, %183, %172 : vector<32x1xi1>, vector<32x1xi32>
    %c1_i32_62 = arith.constant 1 : i32
    %185 = vector.broadcast %c1_i32_62 : i32 to vector<32x1xi32>
    %186 = arith.cmpi sge, %184, %185 : vector<32x1xi32>
    %cst_63 = arith.constant 0.000000e+00 : f32
    %187 = vector.broadcast %cst_63 : f32 to vector<32x128xf32>
    %188 = vector.shape_cast %186 : vector<32x1xi1> to vector<32x1xi1>
    %189 = vector.broadcast %188 : vector<32x1xi1> to vector<32x128xi1>
    %190 = arith.select %189, %168, %187 : vector<32x128xi1>, vector<32x128xf32>
    %191 = arith.truncf %190 : vector<32x128xf32> to vector<32x128xbf16>
    %c0_64 = arith.constant 0 : index
    %c0_65 = arith.constant 0 : index
    %c0_66 = arith.constant 0 : index
    %192 = vector.load %arg5[%c0_64, %c0_65, %c0_66] : memref<3x128x128xbf16, #tpu.memory_space<vmem>>, vector<1x128x128xbf16>
    %193 = vector.shape_cast %192 : vector<1x128x128xbf16> to vector<128x128xbf16>
    %cst_67 = arith.constant dense<0.000000e+00> : vector<32x128xf32>
    %194 = tpu.matmul %191, %193, %cst_67 {dimension_numbers = #tpu.dot_dimension_numbers<[1], [0], [0], [1], [0, 0, 1, 1], [], []>} : vector<32x128xbf16>, vector<128x128xbf16>, vector<32x128xf32> -> vector<32x128xf32>
    %195 = arith.addf %165, %194 : vector<32x128xf32>
    %196 = vector.extract_strided_slice %161 {offsets = [1, 0], sizes = [31, 128], strides = [1, 1]} : vector<32x128xf32> to vector<31x128xf32>
    %197 = vector.extract_strided_slice %161 {offsets = [0, 0], sizes = [1, 128], strides = [1, 1]} : vector<32x128xf32> to vector<1x128xf32>
    %198 = tpu.concatenate %196, %197 in 0 : vector<31x128xf32>, vector<1x128xf32> -> vector<32x128xf32>
    %c16_i32_68 = arith.constant 16 : i32
    %c0_i32_69 = arith.constant 0 : i32
    %199 = arith.cmpi eq, %c16_i32_68, %c0_i32_69 : i32
    %c1_i32_70 = arith.constant 1 : i32
    %200 = arith.select %199, %c1_i32_70, %c16_i32_68 : i32
    %201 = vector.broadcast %200 : i32 to vector<32x1xi32>
    %202 = arith.remsi %0, %201 : vector<32x1xi32>
    %c0_i32_71 = arith.constant 0 : i32
    %203 = vector.broadcast %c0_i32_71 : i32 to vector<32x1xi32>
    %204 = arith.cmpi ne, %202, %203 : vector<32x1xi32>
    %c0_i32_72 = arith.constant 0 : i32
    %205 = vector.broadcast %c0_i32_72 : i32 to vector<32x1xi32>
    %206 = arith.cmpi slt, %202, %205 : vector<32x1xi32>
    %c0_i32_73 = arith.constant 0 : i32
    %207 = arith.cmpi slt, %200, %c0_i32_73 : i32
    %208 = vector.broadcast %207 : i1 to vector<32x1xi1>
    %209 = vector.broadcast %208 : vector<32x1xi1> to vector<32x1xi1>
    %210 = arith.xori %206, %209 : vector<32x1xi1>
    %211 = arith.andi %210, %204 : vector<32x1xi1>
    %212 = vector.broadcast %200 : i32 to vector<32x1xi32>
    %213 = arith.addi %202, %212 : vector<32x1xi32>
    %214 = arith.select %211, %213, %202 : vector<32x1xi1>, vector<32x1xi32>
    %c15_i32_74 = arith.constant 15 : i32
    %215 = vector.broadcast %c15_i32_74 : i32 to vector<32x1xi32>
    %216 = arith.cmpi slt, %214, %215 : vector<32x1xi32>
    %cst_75 = arith.constant 0.000000e+00 : f32
    %217 = vector.broadcast %cst_75 : f32 to vector<32x128xf32>
    %218 = vector.shape_cast %216 : vector<32x1xi1> to vector<32x1xi1>
    %219 = vector.broadcast %218 : vector<32x1xi1> to vector<32x128xi1>
    %220 = arith.select %219, %198, %217 : vector<32x128xi1>, vector<32x128xf32>
    %221 = arith.truncf %220 : vector<32x128xf32> to vector<32x128xbf16>
    %c2 = arith.constant 2 : index
    %c0_76 = arith.constant 0 : index
    %c0_77 = arith.constant 0 : index
    %222 = vector.load %arg5[%c2, %c0_76, %c0_77] : memref<3x128x128xbf16, #tpu.memory_space<vmem>>, vector<1x128x128xbf16>
    %223 = vector.shape_cast %222 : vector<1x128x128xbf16> to vector<128x128xbf16>
    %cst_78 = arith.constant dense<0.000000e+00> : vector<32x128xf32>
    %224 = tpu.matmul %221, %223, %cst_78 {dimension_numbers = #tpu.dot_dimension_numbers<[1], [0], [0], [1], [0, 0, 1, 1], [], []>} : vector<32x128xbf16>, vector<128x128xbf16>, vector<32x128xf32> -> vector<32x128xf32>
    %225 = arith.addf %195, %224 : vector<32x128xf32>
    %c0_79 = arith.constant 0 : index
    %c0_80 = arith.constant 0 : index
    %226 = vector.load %arg12[%c0_79, %c0_80] : memref<1x128xf32, #tpu.memory_space<vmem>>, vector<1x128xf32>
    %227 = vector.broadcast %226 : vector<1x128xf32> to vector<32x128xf32>
    %228 = arith.addf %225, %227 : vector<32x128xf32>
    %c0_81 = arith.constant 0 : index
    %c0_82 = arith.constant 0 : index
    %229 = vector.load %arg13[%c0_81, %c0_82] : memref<1x128xf32, #tpu.memory_space<vmem>>, vector<1x128xf32>
    %c0_83 = arith.constant 0 : index
    %c0_84 = arith.constant 0 : index
    %230 = vector.load %arg14[%c0_83, %c0_84] : memref<1x128xf32, #tpu.memory_space<vmem>>, vector<1x128xf32>
    %c0_85 = arith.constant 0 : index
    %c0_86 = arith.constant 0 : index
    %231 = vector.load %arg15[%c0_85, %c0_86] : memref<128x128xf32, #tpu.memory_space<vmem>>, vector<128x128xf32>
    %232 = vector.extract_strided_slice %228 {offsets = [0, 0], sizes = [16, 128], strides = [1, 1]} : vector<32x128xf32> to vector<16x128xf32>
    %cst_87 = arith.constant dense<0.000000e+00> : vector<128xf32>
    %233 = vector.multi_reduction <add>, %232, %cst_87 [0] : vector<16x128xf32> to vector<128xf32>
    %234 = vector.shape_cast %233 : vector<128xf32> to vector<1x128xf32>
    %235 = arith.mulf %232, %232 : vector<16x128xf32>
    %cst_88 = arith.constant dense<0.000000e+00> : vector<128xf32>
    %236 = vector.multi_reduction <add>, %235, %cst_88 [0] : vector<16x128xf32> to vector<128xf32>
    %237 = vector.shape_cast %236 : vector<128xf32> to vector<1x128xf32>
    %238 = vector.extract_strided_slice %228 {offsets = [16, 0], sizes = [16, 128], strides = [1, 1]} : vector<32x128xf32> to vector<16x128xf32>
    %cst_89 = arith.constant dense<0.000000e+00> : vector<128xf32>
    %239 = vector.multi_reduction <add>, %238, %cst_89 [0] : vector<16x128xf32> to vector<128xf32>
    %240 = vector.shape_cast %239 : vector<128xf32> to vector<1x128xf32>
    %241 = arith.mulf %238, %238 : vector<16x128xf32>
    %cst_90 = arith.constant dense<0.000000e+00> : vector<128xf32>
    %242 = vector.multi_reduction <add>, %241, %cst_90 [0] : vector<16x128xf32> to vector<128xf32>
    %243 = vector.shape_cast %242 : vector<128xf32> to vector<1x128xf32>
    %244 = tpu.concatenate %234, %237, %240, %243 in 0 : vector<1x128xf32>, vector<1x128xf32>, vector<1x128xf32>, vector<1x128xf32> -> vector<4x128xf32>
    %cst_91 = arith.constant dense<0.000000e+00> : vector<4x128xf32>
    %245 = tpu.matmul %244, %231, %cst_91 {dimension_numbers = #tpu.dot_dimension_numbers<[1], [0], [0], [1], [0, 0, 1, 1], [], []>} : vector<4x128xf32>, vector<128x128xf32>, vector<4x128xf32> -> vector<4x128xf32>
    %246 = vector.extract_strided_slice %245 {offsets = [0, 0], sizes = [1, 128], strides = [1, 1]} : vector<4x128xf32> to vector<1x128xf32>
    %247 = vector.extract_strided_slice %245 {offsets = [1, 0], sizes = [1, 128], strides = [1, 1]} : vector<4x128xf32> to vector<1x128xf32>
    %248 = arith.mulf %246, %246 : vector<1x128xf32>
    %249 = arith.subf %247, %248 : vector<1x128xf32>
    %cst_92 = arith.constant 9.99999974E-6 : f32
    %250 = vector.broadcast %cst_92 : f32 to vector<1x128xf32>
    %251 = arith.addf %249, %250 : vector<1x128xf32>
    %252 = math.rsqrt %251 : vector<1x128xf32>
    %253 = arith.mulf %252, %229 : vector<1x128xf32>
    %254 = arith.mulf %246, %253 : vector<1x128xf32>
    %255 = arith.subf %230, %254 : vector<1x128xf32>
    %256 = vector.extract_strided_slice %245 {offsets = [2, 0], sizes = [1, 128], strides = [1, 1]} : vector<4x128xf32> to vector<1x128xf32>
    %257 = vector.extract_strided_slice %245 {offsets = [3, 0], sizes = [1, 128], strides = [1, 1]} : vector<4x128xf32> to vector<1x128xf32>
    %258 = arith.mulf %256, %256 : vector<1x128xf32>
    %259 = arith.subf %257, %258 : vector<1x128xf32>
    %cst_93 = arith.constant 9.99999974E-6 : f32
    %260 = vector.broadcast %cst_93 : f32 to vector<1x128xf32>
    %261 = arith.addf %259, %260 : vector<1x128xf32>
    %262 = math.rsqrt %261 : vector<1x128xf32>
    %263 = arith.mulf %262, %229 : vector<1x128xf32>
    %264 = arith.mulf %256, %263 : vector<1x128xf32>
    %265 = arith.subf %230, %264 : vector<1x128xf32>
    %c16_i32_94 = arith.constant 16 : i32
    %266 = vector.broadcast %c16_i32_94 : i32 to vector<32x1xi32>
    %267 = arith.cmpi slt, %0, %266 : vector<32x1xi32>
    %268 = vector.shape_cast %267 : vector<32x1xi1> to vector<32x1xi1>
    %269 = vector.broadcast %268 : vector<32x1xi1> to vector<32x128xi1>
    %270 = vector.shape_cast %253 : vector<1x128xf32> to vector<1x128xf32>
    %271 = vector.broadcast %270 : vector<1x128xf32> to vector<32x128xf32>
    %272 = vector.shape_cast %263 : vector<1x128xf32> to vector<1x128xf32>
    %273 = vector.broadcast %272 : vector<1x128xf32> to vector<32x128xf32>
    %274 = arith.select %269, %271, %273 : vector<32x128xi1>, vector<32x128xf32>
    %275 = arith.mulf %228, %274 : vector<32x128xf32>
    %c16_i32_95 = arith.constant 16 : i32
    %276 = vector.broadcast %c16_i32_95 : i32 to vector<32x1xi32>
    %277 = arith.cmpi slt, %0, %276 : vector<32x1xi32>
    %278 = vector.shape_cast %277 : vector<32x1xi1> to vector<32x1xi1>
    %279 = vector.broadcast %278 : vector<32x1xi1> to vector<32x128xi1>
    %280 = vector.shape_cast %255 : vector<1x128xf32> to vector<1x128xf32>
    %281 = vector.broadcast %280 : vector<1x128xf32> to vector<32x128xf32>
    %282 = vector.shape_cast %265 : vector<1x128xf32> to vector<1x128xf32>
    %283 = vector.broadcast %282 : vector<1x128xf32> to vector<32x128xf32>
    %284 = arith.select %279, %281, %283 : vector<32x128xi1>, vector<32x128xf32>
    %285 = arith.addf %275, %284 : vector<32x128xf32>
    %286 = arith.negf %285 : vector<32x128xf32>
    %287 = math.exp %286 : vector<32x128xf32>
    %cst_96 = arith.constant 1.000000e+00 : f32
    %288 = vector.broadcast %cst_96 : f32 to vector<32x128xf32>
    %289 = arith.addf %288, %287 : vector<32x128xf32>
    %290 = arith.divf %288, %289 : vector<32x128xf32>
    %291 = arith.mulf %285, %290 : vector<32x128xf32>
    %292 = arith.addf %9, %291 : vector<32x128xf32>
    %c0_97 = arith.constant 0 : index
    %c0_98 = arith.constant 0 : index
    %293 = vector.load %arg17[%c0_97, %c0_98] : memref<32x128xf32, #tpu.memory_space<vmem>>, vector<32x128xf32>
    tpu.vector_store %arg17[%c0_97, %c0_98], %292 {strides = array<i32>} : memref<32x128xf32, #tpu.memory_space<vmem>>, vector<32x128xf32>,
    return
  }
  func.func @transform_0(%arg0: i32) -> (i32, i32) {
    %c0_i32 = arith.constant 0 : i32
    %c0_i32_0 = arith.constant 0 : i32
    return %arg0, %c0_i32 : i32, i32
  }
  func.func @transform_1(%arg0: i32) -> (i32, i32, i32) {
    %c0_i32 = arith.constant 0 : i32
    %c0_i32_0 = arith.constant 0 : i32
    %c0_i32_1 = arith.constant 0 : i32
    return %arg0, %c0_i32, %c0_i32_0 : i32, i32, i32
  }
  func.func @transform_2(%arg0: i32) -> (i32, i32, i32) {
    %c0_i32 = arith.constant 0 : i32
    %c0_i32_0 = arith.constant 0 : i32
    %c0_i32_1 = arith.constant 0 : i32
    %c0_i32_2 = arith.constant 0 : i32
    return %c0_i32, %c0_i32_0, %c0_i32_1 : i32, i32, i32
  }
  func.func @transform_3(%arg0: i32) -> (i32, i32) {
    %c0_i32 = arith.constant 0 : i32
    %c0_i32_0 = arith.constant 0 : i32
    %c0_i32_1 = arith.constant 0 : i32
    return %c0_i32, %c0_i32_0 : i32, i32
  }
  func.func @transform_4(%arg0: i32) -> (i32, i32, i32) {
    %c0_i32 = arith.constant 0 : i32
    %c0_i32_0 = arith.constant 0 : i32
    %c0_i32_1 = arith.constant 0 : i32
    %c0_i32_2 = arith.constant 0 : i32
    return %c0_i32, %c0_i32_0, %c0_i32_1 : i32, i32, i32
  }
  func.func @transform_5(%arg0: i32) -> (i32, i32) {
    %c0_i32 = arith.constant 0 : i32
    %c0_i32_0 = arith.constant 0 : i32
    %c0_i32_1 = arith.constant 0 : i32
    return %c0_i32, %c0_i32_0 : i32, i32
  }
  func.func @transform_6(%arg0: i32) -> (i32, i32) {
    %c0_i32 = arith.constant 0 : i32
    %c0_i32_0 = arith.constant 0 : i32
    %c0_i32_1 = arith.constant 0 : i32
    return %c0_i32, %c0_i32_0 : i32, i32
  }
  func.func @transform_7(%arg0: i32) -> (i32, i32) {
    %c0_i32 = arith.constant 0 : i32
    %c0_i32_0 = arith.constant 0 : i32
    %c0_i32_1 = arith.constant 0 : i32
    return %c0_i32, %c0_i32_0 : i32, i32
  }
  func.func @transform_8(%arg0: i32) -> (i32, i32) {
    %c0_i32 = arith.constant 0 : i32
    %c0_i32_0 = arith.constant 0 : i32
    %c0_i32_1 = arith.constant 0 : i32
    return %c0_i32, %c0_i32_0 : i32, i32
  }
  func.func @transform_9(%arg0: i32) -> (i32, i32) {
    %c0_i32 = arith.constant 0 : i32
    %c0_i32_0 = arith.constant 0 : i32
    %c0_i32_1 = arith.constant 0 : i32
    return %c0_i32, %c0_i32_0 : i32, i32
  }
  func.func @transform_10(%arg0: i32) -> (i32, i32) {
    %c0_i32 = arith.constant 0 : i32
    %c0_i32_0 = arith.constant 0 : i32
    %c0_i32_1 = arith.constant 0 : i32
    return %c0_i32, %c0_i32_0 : i32, i32
  }
  func.func @transform_11(%arg0: i32) -> (i32, i32) {
    %c0_i32 = arith.constant 0 : i32
    %c0_i32_0 = arith.constant 0 : i32
    %c0_i32_1 = arith.constant 0 : i32
    return %c0_i32, %c0_i32_0 : i32, i32
  }
  func.func @transform_12(%arg0: i32) -> (i32, i32) {
    %c0_i32 = arith.constant 0 : i32
    %c0_i32_0 = arith.constant 0 : i32
    %c0_i32_1 = arith.constant 0 : i32
    return %c0_i32, %c0_i32_0 : i32, i32
  }
  func.func @transform_13(%arg0: i32) -> (i32, i32) {
    %c0_i32 = arith.constant 0 : i32
    %c0_i32_0 = arith.constant 0 : i32
    %c0_i32_1 = arith.constant 0 : i32
    return %c0_i32, %c0_i32_0 : i32, i32
  }
  func.func @transform_14(%arg0: i32) -> (i32, i32) {
    %c0_i32 = arith.constant 0 : i32
    %c0_i32_0 = arith.constant 0 : i32
    %c0_i32_1 = arith.constant 0 : i32
    return %c0_i32, %c0_i32_0 : i32, i32
  }
  func.func @transform_15(%arg0: i32) -> (i32, i32) {
    %c0_i32 = arith.constant 0 : i32
    %c0_i32_0 = arith.constant 0 : i32
    %c0_i32_1 = arith.constant 0 : i32
    return %c0_i32, %c0_i32_0 : i32, i32
  }
  func.func @transform_16(%arg0: i32) -> (i32, i32) {
    %c0_i32 = arith.constant 0 : i32
    %c0_i32_0 = arith.constant 0 : i32
    return %arg0, %c0_i32 : i32, i32
  }
}

</mosaic_0001>

<bundles_post_ra>
// kernel: tpu_custom_call.1
= control target key start
LH: loop header
LB: loop body
LE: loop exit
PB: predicated region body
PF: predicated region fallthrough
CT: control target
= control target key end

     0   :  { %s2502_s0 = inlined_call_operand.hbm [shape: f32[32,64], index: 0, kind: input, shape index: {}]   ;;  %s2503_s1 = inlined_call_operand.hbm [shape: f32[1,2,8], index: 1, kind: input, shape index: {}]   ;;  %s2504_s2 = inlined_call_operand.hbm [shape: bf16[2,64,128], index: 2, kind: input, shape index: {}]   ;;  %s2505_s3 = inlined_call_operand.hbm [shape: bf16[64,256], index: 3, kind: input, shape index: {}]   ;;  %s2506_s4 = inlined_call_operand.hbm [shape: bf16[3,128,128], index: 4, kind: input, shape index: {}]   ;;  %s2507_s5 = inlined_call_operand.vmem [shape: bf16[8,128], index: 5, kind: input, shape index: {}]   ;;  %s2508_s6 = inlined_call_operand.vmem [shape: f32[1,128], index: 6, kind: input, shape index: {}]   ;;  %s2509_s7 = inlined_call_operand.vmem [shape: f32[1,128], index: 7, kind: input, shape index: {}]   ;;  %s2510_s8 = inlined_call_operand.vmem [shape: f32[1,128], index: 8, kind: input, shape index: {}]   ;;  %s2511_s9 = inlined_call_operand.vmem [shape: f32[1,128], index: 9, kind: input, shape index: {}]   ;;  %s2512_s10 = inlined_call_operand.hbm [shape: f32[128,128], index: 10, kind: input, shape index: {}]   ;;  %s2513_s11 = inlined_call_operand.vmem [shape: f32[1,128], index: 11, kind: input, shape index: {}]   ;;  %s2514_s12 = inlined_call_operand.vmem [shape: f32[1,128], index: 12, kind: input, shape index: {}]   ;;  %s2515_s13 = inlined_call_operand.vmem [shape: f32[1,128], index: 13, kind: input, shape index: {}]   ;;  %s2516_s14 = inlined_call_operand.hbm [shape: f32[128,128], index: 14, kind: input, shape index: {}]   ;;  %s2517_s15 = inlined_call_operand.vmem [shape: f32[1,128], index: 15, kind: input, shape index: {}]   ;;  %s2518_s16 = inlined_call_operand.hbm [shape: f32[32,128], index: 16, kind: output, shape index: {}]  }
   0x1   :  { %2519 = sst [smem:[#allocation20_spill]] %s2502_s0 }
   0x2   :  { %21 = vsyncpa [#allocation3], 0 }
   0x3   :  { %22 = vsyncpa [#allocation6], 0 }
   0x4   :  { %23 = vsyncpa [#allocation9], 0 }
   0x5   :  { %24 = vsyncpa [#allocation12], 0 }
   0x6   :  { %25 = vsyncpa [#allocation4], 0  ;;  %s2142_s21 = smov [#allocation5]  }
   0x7   :  { %s44_s22 = sshll.u32 %s2142_s21, 4  ;;  %s45_s22 = int_to_ptr.vmem [resolvable:$true] %s44_s22 }
   0x8   :  { %s1980_s23 = scalar_lea.vmem %s45_s22, 32  ;;  %p1985_p1 = scmp.lt.s32.totalorder %s45_s22, %s45_s22 }
   0x9   :  { %p1981_p0 = scmp.ne.s32.totalorder %s45_s22, %s1980_s23  ;;  %p1986_p2 = scmp.lt.s32.totalorder %s1980_s23, %s1980_s23 }
   0xb   :  { %p1987_p3 = por %p1986_p2, %p1985_p1 }
   0xd   :  { %p1988_p4 = pnand %p1987_p3, %p1981_p0 }
   0xf   :  { %1991 = shalt.err (!%p1988_p4)
}
  0x10   :  { %47 = dma.hbm_to_vmem [thread:$0]  %s2503_s1, 32, %s45_s22, [#allocation6]  }
  0x11   :  { %s2143_s26 = smov [#allocation8]   ;;  %s2144_s28 = smov [#allocation11]  }
  0x12   :  { %s65_s27 = sshll.u32 %s2143_s26, 4  ;;  %s99_s29 = sshll.u32 %s2144_s28, 4  ;;  %s66_s27 = int_to_ptr.vmem [resolvable:$true] %s65_s27  ;;  %s100_s29 = int_to_ptr.vmem [resolvable:$true] %s99_s29 }
  0x13   :  { %s2000_s30 = scalar_lea.vmem %s66_s27, 1024  ;;  %p2005_p6 = scmp.lt.s32.totalorder %s66_s27, %s66_s27 }
  0x14   :  { %p2001_p5 = scmp.ne.s32.totalorder %s66_s27, %s2000_s30  ;;  %p2006_p7 = scmp.lt.s32.totalorder %s2000_s30, %s2000_s30 }
  0x16   :  { %p2007_p8 = por %p2006_p7, %p2005_p6 }
  0x18   :  { %p2008_p9 = pnand %p2007_p8, %p2001_p5 }
  0x1a   :  { %2011 = shalt.err (!%p2008_p9)
}
  0x1b   :  { %s2145_s0 = smov 128   ;;  %s2146_s17 = smov 8  }
  0x1c   :  { %71 = dma.hbm_to_vmem [thread:$0]  %s2505_s3, 1024, %s66_s27, [#allocation9], %s2145_s0, %s2145_s0, %s2146_s17  }
  0x1d   :  { %s2020_s1 = scalar_lea.vmem %s100_s29, 2048  ;;  %p2025_p11 = scmp.lt.s32.totalorder %s100_s29, %s100_s29 }
  0x1e   :  { %p2021_p10 = scmp.ne.s32.totalorder %s100_s29, %s2020_s1  ;;  %p2026_p12 = scmp.lt.s32.totalorder %s2020_s1, %s2020_s1 }
  0x20   :  { %p2027_p13 = por %p2026_p12, %p2025_p11 }
  0x22   :  { %p2028_p0 = pnand %p2027_p13, %p2021_p10 }
  0x24   :  { %2031 = shalt.err (!%p2028_p0)
}
  0x25   :  { %105 = dma.hbm_to_vmem [thread:$0]  %s2512_s10, 2048, %s100_s29, [#allocation12], %s2145_s0, %s2145_s0, %s2146_s17  }
  0x26   :  { %s2147_s22 = smov [#allocation2]   ;;  %s2148_s24 = smov [#allocation7]  }
  0x27   :  { %s31_s23 = sshll.u32 %s2147_s22, 4  ;;  %s53_s3 = sshll.u32 %s2148_s24, 4  ;;  %s32_s23 = int_to_ptr.vmem [resolvable:$true] %s31_s23  ;;  %s54_s3 = int_to_ptr.vmem [resolvable:$true] %s53_s3 }
  0x28   :  { %s2040_s25 = scalar_lea.vmem %s32_s23, 512  ;;  %p2045_p2 = scmp.lt.s32.totalorder %s32_s23, %s32_s23 }
  0x29   :  { %p2041_p1 = scmp.ne.s32.totalorder %s32_s23, %s2040_s25  ;;  %p2046_p3 = scmp.lt.s32.totalorder %s2040_s25, %s2040_s25 }
  0x2b   :  { %p2047_p4 = por %p2046_p3, %p2045_p2 }
  0x2d   :  { %p2048_p5 = pnand %p2047_p4, %p2041_p1 }
  0x2f   :  { %2051 = shalt.err (!%p2048_p5)
}
  0x30   :  { %s2520_s28 = sld [smem:[#allocation20_spill]]  ;;  %s2060_s10 = scalar_lea.vmem %s54_s3, 1024 }
  0x31   :  { %p2061_p6 = scmp.ne.s32.totalorder %s54_s3, %s2060_s10  ;;  %p2065_p7 = scmp.lt.s32.totalorder %s54_s3, %s54_s3 }
  0x32   :  { %p2066_p8 = scmp.lt.s32.totalorder %s2060_s10, %s2060_s10 }
  0x34   :  { %p2067_p9 = por %p2066_p8, %p2065_p7 }
  0x36   :  { %37 = dma.hbm_to_vmem [thread:$0]  %s2520_s28, 512, %s32_s23, [#allocation3], %s2145_s0, %s2145_s0, %s2146_s17  }
  0x37   :  { %p2068_p10 = pnand %p2067_p9, %p2061_p6 }
  0x39   :  { %2071 = shalt.err (!%p2068_p10)
}
  0x3a   :  { %s2149_s29 = smov 64   ;;  %s2150_s30 = smov 4  }
  0x3b   :  { %59 = dma.hbm_to_vmem [thread:$0]  %s2504_s2, 1024, %s54_s3, [#allocation6], %s2149_s29, %s2149_s29, %s2150_s30  }
  0x3c   :  { %s2151_s1 = smov [#allocation10]   ;;  %s2152_s21 = smov [#allocation13]  }
  0x3d   :  { %s77_s20 = sshll.u32 %s2151_s1, 4  ;;  %s117_s22 = sshll.u32 %s2152_s21, 4  ;;  %s78_s20 = int_to_ptr.vmem [resolvable:$true] %s77_s20  ;;  %s118_s22 = int_to_ptr.vmem [resolvable:$true] %s117_s22 }
  0x3e   :  { %s2080_s23 = scalar_lea.vmem %s78_s20, 3072  ;;  %p2085_p12 = scmp.lt.s32.totalorder %s78_s20, %s78_s20 }
  0x3f   :  { %p2081_p11 = scmp.ne.s32.totalorder %s78_s20, %s2080_s23  ;;  %p2086_p13 = scmp.lt.s32.totalorder %s2080_s23, %s2080_s23 }
  0x41   :  { %p2087_p0 = por %p2086_p13, %p2085_p12 }
  0x43   :  { %p2088_p1 = pnand %p2087_p0, %p2081_p11 }
  0x45   :  { %2091 = shalt.err (!%p2088_p1)
}
  0x46   :  { %83 = dma.hbm_to_vmem [thread:$0]  %s2506_s4, 3072, %s78_s20, [#allocation9], %s2149_s29, %s2149_s29, %s2150_s30  }
  0x47   :  { %s2100_s26 = scalar_lea.vmem %s118_s22, 2048  ;;  %p2105_p3 = scmp.lt.s32.totalorder %s118_s22, %s118_s22 }
  0x48   :  { %p2101_p2 = scmp.ne.s32.totalorder %s118_s22, %s2100_s26  ;;  %p2106_p4 = scmp.lt.s32.totalorder %s2100_s26, %s2100_s26 }
  0x4a   :  { %p2107_p5 = por %p2106_p4, %p2105_p3 }
  0x4c   :  { %p2108_p6 = pnand %p2107_p5, %p2101_p2 }
  0x4e   :  { %2111 = shalt.err (!%p2108_p6)
}
  0x4f   :  { %123 = dma.hbm_to_vmem [thread:$0]  %s2516_s14, 2048, %s118_s22, [#allocation12], %s2145_s0, %s2145_s0, %s2146_s17  }
  0x50   :  { %2132 = dma.done.wait [#allocation3], 512  }
  0x51   :  { %2133 = vsyncadd [#allocation3], 4294966784 }
  0x52   :  { %2134 = dma.done.wait [#allocation6], 1056  }
  0x53   :  { %2135 = vsyncadd [#allocation6], 4294966240 }
  0x54   :  { %2136 = dma.done.wait [#allocation9], 4096  }
  0x55   :  { %2137 = vsyncadd [#allocation9], 4294963200 }
  0x56   :  { %2138 = dma.done.wait [#allocation12], 4096  }
  0x57   :  { %2139 = vsyncadd [#allocation12], 4294963200  ;;  %v148_v0 = vlaneseq  ;;  %v2153_v1 = vmov 0   ;;  %v1888_v3 = vld [vmem:[#allocation8 + $0x34] ss:$8 sps:$4 sm:$0xff]   ;;  %v1898_v16 = vld [vmem:[#allocation7 + $0x8] sm:$0xff]  }
  0x58   :  { %246 = vmatprep.mubr.bf16.mxu0 %v2153_v1  ;;  %v1890_v5 = vld [vmem:[#allocation7 + $0x18] sm:$0xff]   ;;  %222 = vmatprep.subr.bf16.mxu0 %v1888_v3  ;;  %v1892_v9 = vld [vmem:[#allocation8 + $0x24] ss:$8 sps:$4 sm:$0xff]   ;;  %v1894_v10 = vld [vmem:[#allocation7 + $0x10] sm:$0xff]   ;;  %vm284_vm0 = vcmask 1040384   ;;  %vm453_vm1 = vcmask 1046528  }
  0x59   :  { %v2278_v2 = vshrl.u32 %v148_v0, 7  ;;  %v1891_v7 = vld [vmem:[#allocation8 + $0x30] ss:$8 sps:$4 sm:$0xff]   ;;  %1711 = vmatprep.subr.bf16.mxu1 %v1890_v5  ;;  %v1895_v11 = vld [vmem:[#allocation8 + $0x20] ss:$8 sps:$4 sm:$0xff]   ;;  %vm207_vm6 = vcmask 523264  }
  0x5a   :  { %223 = vmatpush1.bf16.msra.mxu0 %v1891_v7  ;;  %1712 = vmatpush3.bf16.msra.mxu1 %v1890_v5  ;;  %v1896_v14 = vld [vmem:[#allocation8 + $0x14] ss:$8 sps:$4 sm:$0xff]   ;;  %v1899_v18 = vld [vmem:[#allocation8 + $0x10] ss:$8 sps:$4 sm:$0xff]   ;;  %v1900_v19 = vld [vmem:[#allocation8 + $0x4] ss:$8 sps:$4 sm:$0xff]  }
  0x5b   :  { %v152_v4 = vadd.s32 24, %v2278_v2  ;;  %v151_v6 = vadd.s32 16, %v2278_v2  ;;  %v150_v8 = vadd.s32 8, %v2278_v2  ;;  %v300_v12 = vand.u32 15, %v2278_v2  ;;  %224 = vmatprep.subr.bf16.mxu0 %v1892_v9  ;;  %1713 = vmatprep.subr.bf16.mxu1 %v1894_v10  ;;  %v1902_v20 = vld [vmem:[#allocation7] sm:$0xff]   ;;  %v156_v27 = vld [vmem:[#allocation2 + $0x18] sm:$0xff] }
  0x5c   :  { %v153_v21 = vld [vmem:[#allocation2] sm:$0xff]  ;;  %v154_v22 = vld [vmem:[#allocation2 + $0x8] sm:$0xff]  ;;  %v155_v31 = vld [vmem:[#allocation2 + $0x10] sm:$0xff]  ;;  %v279_v33 = vrot.slane %v156_v27, 7  ;;  %v459_v35 = vrot.slane %v156_v27, 1  ;;  %v2154_v60 = vmov 0.0  }
  0x5d   :  { %v321_v13 = vand.u32 15, %v152_v4  ;;  %v314_v15 = vand.u32 15, %v151_v6  ;;  %v307_v17 = vand.u32 15, %v150_v8  ;;  %vm2284_vm2 = vcmp.ge.s32.totalorder %v300_v12, 1  ;;  %v1903_v26 = vld [vmem:[#allocation8] ss:$8 sps:$4 sm:$0xff]  }
  0x5e   :  { %225 = vmatpush1.bf16.msra.mxu0 %v1895_v11  ;;  %1714 = vmatpush3.bf16.msra.mxu1 %v1894_v10  ;;  %v285_v28 = vrot.slane %v153_v21, 7  ;;  %v286_v29 = vrot.slane %v154_v22, 7  ;;  %v454_v30 = vrot.slane %v153_v21, 1  ;;  %v455_v34 = vrot.slane %v154_v22, 1  ;;  %v1904_v41 = vld [vmem:[#allocation7 + $0x38] sm:$0xff]   ;;  %v1905_v49 = vld [vmem:[#allocation7 + $0x30] sm:$0xff]  }
  0x5f   :  { %226 = vmatprep.subr.bf16.mxu0 %v1896_v14  ;;  %1715 = vmatprep.subr.bf16.mxu1 %v1898_v16  ;;  %vm2288_vm3 = vcmp.lt.s32.totalorder %v321_v13, 15  ;;  %vm2292_vm4 = vcmp.ge.s32.totalorder %v314_v15, 1  ;;  %vm2296_vm5 = vcmp.lt.s32.totalorder %v307_v17, 15  ;;  %v288_v36 = vrot.slane %v155_v31, 7  ;;  %v1906_v53 = vld [vmem:[#allocation7 + $0x28] sm:$0xff]   ;;  %v1907_v56 = vld [vmem:[#allocation7 + $0x20] sm:$0xff]  }
  0x60   :  { %v287_v37 = vsel %vm284_vm0, %v285_v28, %v286_v29  ;;  %v295_v38 = vsel %vm284_vm0, %v279_v33, %v285_v28  ;;  %v466_v39 = vsel %vm453_vm1, %v459_v35, %v454_v30  ;;  %v457_v42 = vrot.slane %v155_v31, 1  ;;  %v605_v61 = vld [vmem:[#allocation11 + $0x78] sm:$0xff]  ;;  %v604_v62 = vld [vmem:[#allocation11 + $0x70] sm:$0xff]  ;;  %v603_v63 = vld [vmem:[#allocation11 + $0x68] sm:$0xff]  ;;  %s2158_s20 = smov [#allocation14]  }
  0x61   :  { %v289_v40 = vsel %vm284_vm0, %v286_v29, %v288_v36  ;;  %v356_v43 = vsel %vm2284_vm2, %v295_v38, 0.0  ;;  %v290_v44 = vsel %vm284_vm0, %v288_v36, %v279_v33  ;;  %v157_v47 = vpack.c.bf16 %v154_v22, %v153_v21  ;;  %v602_v0 = vld [vmem:[#allocation11 + $0x60] sm:$0xff]  ;;  %v600_v3 = vld [vmem:[#allocation11 + $0x50] sm:$0xff]  ;;  %v599_v4 = vld [vmem:[#allocation11 + $0x48] sm:$0xff]  ;;  %s1544_s21 = sshll.u32 %s2158_s20, 4  ;;  %s1545_s21 = int_to_ptr.vmem [resolvable:$true] %s1544_s21 }
  0x62   :  { %227 = vmatpush1.bf16.msra.mxu0 %v1899_v18  ;;  %1716 = vmatpush3.bf16.msra.mxu1 %v1898_v16  ;;  %v358_v45 = vsel %vm2292_vm4, %v289_v40, 0.0  ;;  %v360_v46 = vpack.c.bf16 %v287_v37, %v356_v43  ;;  %v458_v50 = vsel %vm453_vm1, %v455_v34, %v457_v42  ;;  %v482_v51 = vsel %vm2288_vm3, %v466_v39, 0.0  ;;  %v598_v5 = vld [vmem:[#allocation11 + $0x40] sm:$0xff]  ;;  %v597_v6 = vld [vmem:[#allocation11 + $0x38] sm:$0xff]  ;;  %v596_v7 = vld [vmem:[#allocation11 + $0x30] sm:$0xff]  ;;  %p2117_p8 = scmp.lt.s32.totalorder %s1545_s21, %s1545_s21 }
  0x63   :  { %228 = vmatprep.subr.bf16.mxu0 %v1900_v19  ;;  %1717 = vmatprep.subr.bf16.mxu1 %v1902_v20  ;;  %v361_v48 = vpack.c.bf16 %v290_v44, %v358_v45  ;;  %v480_v52 = vsel %vm2296_vm5, %v458_v50, 0.0  ;;  %v456_v54 = vsel %vm453_vm1, %v454_v30, %v455_v34  ;;  %v158_v55 = vpack.c.bf16 %v156_v27, %v155_v31  ;;  %v595_v8 = vld [vmem:[#allocation11 + $0x28] sm:$0xff]  ;;  %v594_v9 = vld [vmem:[#allocation11 + $0x20] sm:$0xff]  ;;  %v593_v10 = vld [vmem:[#allocation11 + $0x18] sm:$0xff] }
  0x64   :  { %1719 = vmatprep.mubr.msk.bf16.mxu1 %vm207_vm6, %v360_v46  ;;  %v483_v57 = vpack.c.bf16 %v480_v52, %v456_v54  ;;  %v460_v58 = vsel %vm453_vm1, %v457_v42, %v459_v35  ;;  %v592_v11 = vld [vmem:[#allocation11 + $0x10] sm:$0xff]  ;;  %vm2155_vm7 = vmmov 0   ;;  %v591_v12 = vld [vmem:[#allocation11 + $0x8] sm:$0xff]  ;;  %v590_v13 = vld [vmem:[#allocation11] sm:$0xff]  ;;  %vm847_vm8 = vcmask 1043456  }
  0x65   :  { %v484_v59 = vpack.c.bf16 %v482_v51, %v460_v58  ;;  %v835_v14 = vld [vmem:[%s2507_s5] sm:$0xf]  ;;  %vm843_vm9 = vcmask 64512   ;;  %vm639_vm10 = vcmask 1041408   ;;  %vm641_vm11 = vcmask 1042432   ;;  %v1925_v23 = vld [vmem:[#allocation10 + $0xb0] sm:$0xff]  }
  0x66   :  { %229 = vmatpush1.bf16.msra.mxu0 %v1903_v26  ;;  %1718 = vmatpush3.bf16.msra.mxu1 %v1902_v20  ;;  %v826_v15 = vld [vmem:[#allocation5] sm:$0x3]  ;;  %v849_v16 = vsel %vm847_vm8, %v835_v14, 0  ;;  %vm2157_vm12 = vmmov 1   ;;  %v1926_v25 = vld [vmem:[#allocation10 + $0xa8] sm:$0xff]  }
  0x67   :  { %1723 = vmatprep.subr.bf16.mxu0 %v1904_v41  ;;  %1735 = vmatprep.subr.mxu1 %v2154_v60  ;;  %v1588_v17 = vmul.f32 -1.442695, %v826_v15  ;;  %v1582_v43 = vld [vmem:[%s2509_s7] ss:$0 sm:$0xff]  ;;  %vm1599_vm13 = vmpackc.low %vm2157_vm12, %vm2284_vm2  ;;  %v1930_v32 = vld [vmem:[#allocation10 + $0x88] sm:$0xff]  }
  0x68   :  { %vm1602_vm14 = vmpackc.low %vm2157_vm12, %vm2292_vm4  ;;  %v1320_v24 = vld [vmem:[#allocation13 + $0x58] sm:$0xff] }
  0x69   :  { %1567 = vmatmul.mubr.msk.bf16.vlgmr.msra.gmra.mxu0 %vm207_vm6, %v157_v47  ;;  %1720 = vmatmul.mubr.msk.bf16.vlgmr.msra.gmra.mxu1 %vm207_vm6, %v361_v48  ;;  %1932 = vpow2.f32 %v1588_v17  ;;  %vm1621_vm15 = vmpackc.low %vm2296_vm5, %vm2157_vm12 }
  0x6a   :  { %1724 = vmatpush3.bf16.msra.mxu0 %v1904_v41  ;;  %256 = vmatprep.mubr.bf16.mxu0 %v2153_v1  ;;  %v601_v1 = vld [vmem:[#allocation11 + $0x58] sm:$0xff]  ;;  %vm1624_vm2 = vmpackc.low %vm2288_vm3, %vm2157_vm12 }
  0x6b   :  { %1725 = vmatprep.subr.bf16.mxu0 %v1905_v49  ;;  %1736 = vmatpush3.msra.mxu1 %v605_v61 }
  0x6c   :  { %1737 = vmatprep.subr.mxu1 %v2154_v60  ;;  %1767 = vmatprep.mubr.msk.f32.mxu1 %vm2155_vm7, %v2154_v60 }
  0x6d   :  { %1738 = vmatpush3.msra.mxu1 %v604_v62 }
  0x6e   :  { %1726 = vmatpush3.bf16.msra.mxu0 %v1905_v49  ;;  %1739 = vmatprep.subr.mxu1 %v2154_v60 }
  0x6f   :  { %1727 = vmatprep.subr.bf16.mxu0 %v1906_v53  ;;  %1740 = vmatpush3.msra.mxu1 %v603_v63 }
  0x70   :  { %1741 = vmatprep.subr.mxu1 %v2154_v60 }
  0x71   :  { %1568 = vmatmul.mubr.msk.bf16.gmra.mxu0 %vm207_vm6, %v158_v55  ;;  %1742 = vmatpush3.msra.mxu1 %v602_v0 }
  0x72   :  { %1728 = vmatpush3.bf16.msra.mxu0 %v1906_v53  ;;  %1731 = vmatprep.mubr.msk.bf16.mxu0 %vm207_vm6, %v483_v57 }
  0x73   :  { %1729 = vmatprep.subr.bf16.mxu0 %v1907_v56  ;;  %1743 = vmatprep.subr.mxu1 %v2154_v60 }
  0x74   :  { %1744 = vmatpush3.msra.mxu1 %v601_v1 }
  0x75   :  { %1745 = vmatprep.subr.mxu1 %v2154_v60 }
  0x76   :  { %1730 = vmatpush3.bf16.msra.mxu0 %v1907_v56  ;;  %1746 = vmatpush3.msra.mxu1 %v600_v3  ;;  %v1933_v18 = vpop.eup %1932 }
  0x77   :  { %1770 = vmatprep.subr.bf16.mxu0 %v2154_v60  ;;  %1747 = vmatprep.subr.mxu1 %v2154_v60  ;;  %v830_v19 = vadd.f32 1.0, %v1933_v18 }
  0x78   :  { %1748 = vmatpush3.msra.mxu1 %v599_v4 }
  0x79   :  { %1732 = vmatmul.mubr.msk.bf16.vlgmr.msra.gmra.mxu0 %vm207_vm6, %v484_v59  ;;  %1749 = vmatprep.subr.mxu1 %v2154_v60  ;;  %1934 = vrcp.f32 %v830_v19 }
  0x7a   :  { %1750 = vmatpush3.msra.mxu1 %v598_v5  ;;  %1772 = vmatprep.mubr.msk.bf16.mxu0 %vm2155_vm7, %v2154_v60 }
  0x7b   :  { %1751 = vmatprep.subr.mxu1 %v2154_v60  ;;  %1771 = vmatpush3.bf16.msra.mxu0 %v849_v16 }
  0x7c   :  { %1752 = vmatpush3.msra.mxu1 %v597_v6 }
  0x7d   :  { %1753 = vmatprep.subr.mxu1 %v2154_v60 }
  0x7e   :  { %1754 = vmatpush3.msra.mxu1 %v596_v7 }
  0x7f   :  { %1755 = vmatprep.subr.mxu1 %v2154_v60 }
  0x80   :  { %1756 = vmatpush3.msra.mxu1 %v595_v8 }
  0x81   :  { %1757 = vmatprep.subr.mxu1 %v2154_v60 }
  0x82   :  { %1758 = vmatpush3.msra.mxu1 %v594_v9 }
  0x83   :  { %1759 = vmatprep.subr.mxu1 %v2154_v60 }
  0x84   :  { %1760 = vmatpush3.msra.mxu1 %v593_v10 }
  0x85   :  { %1761 = vmatprep.subr.mxu1 %v2154_v60 }
  0x86   :  { %1762 = vmatpush3.msra.mxu1 %v592_v11  ;;  %v1935_v20 = vpop.eup %1934 }
  0x87   :  { %1763 = vmatprep.subr.mxu1 %v2154_v60  ;;  %v833_v21 = vmul.f32 %v1935_v20, %v826_v15 }
  0x88   :  { %1764 = vmatpush3.msra.mxu1 %v591_v12 }
  0x89   :  { %1765 = vmatprep.subr.mxu1 %v2154_v60  ;;  %v834_v22 = vpack.c.bf16 %v833_v21, %v833_v21 }
  0x8a   :  { %1766 = vmatpush3.msra.mxu1 %v590_v13 }
  0x8b   :  { %1773 = vmatmul.mubr.msk.bf16.vlgmr.msra.gmra.mxu0 %vm843_vm9, %v834_v22 }
 0x129   :  { %v248_v26 = vpop.f32.mrf.mxu0  ;;  %v1721_v29 = vpop.f32.mrf.mxu1 }
 0x12b   :  { %v2347_v27 = vpop.f32.mrf.mxu0  ;;  %v434_v33 = vpop.f32.mrf.mxu1 }
 0x12c   :  { %v449_v40 = vadd.f32 %v434_v33, %v248_v26 }
 0x12d   :  { %v252_v28 = vpop.f32.mrf.mxu0  ;;  %v1722_v36 = vpop.f32.mrf.mxu1 }
 0x12f   :  { %v2349_v30 = vpop.f32.mrf.mxu0  ;;  %v437_v42 = vpop.f32.mrf.mxu1 }
 0x130   :  { %v450_v48 = vadd.f32 %v437_v42, %v252_v28  ;;  %v1913_v42 = vld [vmem:[#allocation10 + $0x28] sm:$0xff]  }
 0x131   :  { %v258_v31 = vpop.f32.mrf.mxu0 }
 0x132   :  { %v451_v38 = vadd.f32 %v1721_v29, %v258_v31 }
 0x133   :  { %v2351_v34 = vpop.f32.mrf.mxu0 }
 0x135   :  { %v262_v35 = vpop.f32.mrf.mxu0 }
 0x136   :  { %v452_v45 = vadd.f32 %v1722_v36, %v262_v35  ;;  %v1908_v36 = vld [vmem:[#allocation10 + $0x78] sm:$0xff]  }
 0x137   :  { %v2353_v37 = vpop.f32.mrf.mxu0  ;;  %1796 = vmatprep.subr.bf16.mxu1 %v1908_v36 }
 0x139   :  { %v1733_v39 = vpop.f32.mrf.mxu0 }
 0x13a   :  { %v575_v41 = vadd.f32 %v1733_v39, %v451_v38  ;;  %v1909_v38 = vld [vmem:[#allocation10 + $0x38] sm:$0xff]   ;;  %v1910_v39 = vld [vmem:[#allocation10 + $0x70] sm:$0xff]  }
 0x13b   :  { %v558_v44 = vpop.f32.mrf.mxu0  ;;  %1776 = vmatprep.subr.bf16.mxu0 %v1909_v38 }
 0x13c   :  { %v573_v46 = vadd.f32 %v558_v44, %v449_v40  ;;  %v2358_v49 = vadd.f32 %v1582_v43, %v575_v41  ;;  %v1911_v40 = vld [vmem:[#allocation10 + $0x30] sm:$0xff]   ;;  %1777 = vmatpush3.bf16.msra.mxu0 %v1909_v38  ;;  %v1912_v41 = vld [vmem:[#allocation10 + $0x68] sm:$0xff]   ;;  %v1915_v44 = vld [vmem:[#allocation10 + $0x20] sm:$0xff]  }
 0x13d   :  { %v1734_v47 = vpop.f32.mrf.mxu0  ;;  %1778 = vmatprep.subr.bf16.mxu0 %v1911_v40 }
 0x13e   :  { %v576_v50 = vadd.f32 %v1734_v47, %v452_v45  ;;  %v2360_v51 = vadd.f32 %v1582_v43, %v573_v46  ;;  %v629_v55 = vmul.f32 %v2358_v49, %v2358_v49  ;;  %v1916_v45 = vld [vmem:[#allocation10 + $0x58] sm:$0xff]  }
 0x13f   :  { %v561_v52 = vpop.f32.mrf.mxu0  ;;  %v1917_v47 = vld [vmem:[#allocation10 + $0x18] sm:$0xff]  }
 0x140   :  { %v2362_v53 = vadd.f32 %v1582_v43, %v576_v50  ;;  %v574_v54 = vadd.f32 %v561_v52, %v450_v48  ;;  %v613_v59 = vmul.f32 %v2360_v51, %v2360_v51  ;;  %1779 = vmatpush3.bf16.msra.mxu0 %v1911_v40  ;;  %v1918_v48 = vld [vmem:[#allocation10 + $0x50] sm:$0xff]  }
 0x141   :  { %1780 = vmatprep.subr.bf16.mxu0 %v1913_v42 }
 0x142   :  { %v622_v56 = vadd.f32 %v2362_v53, %v2358_v49  ;;  %v630_v57 = vmul.f32 %v2362_v53, %v2362_v53  ;;  %v2370_v58 = vadd.f32 %v1582_v43, %v574_v54  ;;  %v1914_v43 = vld [vmem:[#allocation10 + $0x60] sm:$0xff]   ;;  %v1919_v54 = vld [vmem:[#allocation10 + $0x10] sm:$0xff]  }
 0x144   :  { %v623_v61 = vrot.slane %v622_v56, 4  ;;  %v631_v62 = vadd.f32 %v630_v57, %v629_v55  ;;  %v606_v63 = vadd.f32 %v2370_v58, %v2360_v51  ;;  %v614_v0 = vmul.f32 %v2370_v58, %v2370_v58  ;;  %1781 = vmatpush3.bf16.msra.mxu0 %v1913_v42  ;;  %v1920_v55 = vld [vmem:[#allocation10 + $0x48] sm:$0xff]  }
 0x145   :  { %1782 = vmatprep.subr.bf16.mxu0 %v1915_v44  ;;  %v1921_v57 = vld [vmem:[#allocation10 + $0x8] sm:$0xff]  }
 0x146   :  { %v624_v1 = vadd.f32 %v623_v61, %v622_v56  ;;  %v632_v3 = vrot.slane %v631_v62, 4  ;;  %v607_v4 = vrot.slane %v606_v63, 4  ;;  %v615_v5 = vadd.f32 %v614_v0, %v613_v59  ;;  %v1922_v59 = vld [vmem:[#allocation10 + $0x40] sm:$0xff]  }
 0x147   :  { %v1923_v61 = vld [vmem:[#allocation10] sm:$0xff]  }
 0x148   :  { %v625_v6 = vrot.slane %v624_v1, 2  ;;  %v633_v7 = vadd.f32 %v632_v3, %v631_v62  ;;  %v608_v8 = vadd.f32 %v607_v4, %v606_v63  ;;  %v616_v9 = vrot.slane %v615_v5, 4  ;;  %1783 = vmatpush3.bf16.msra.mxu0 %v1915_v44  ;;  %v2384_v62 = vld [vmem:[#allocation10 + $0xb8] sm:$0xff]  }
 0x149   :  { %1784 = vmatprep.subr.bf16.mxu0 %v1917_v47 }
 0x14a   :  { %v609_v10 = vrot.slane %v608_v8, 2  ;;  %v617_v11 = vadd.f32 %v616_v9, %v615_v5  ;;  %v634_v12 = vrot.slane %v633_v7, 2  ;;  %v626_v13 = vadd.f32 %v625_v6, %v624_v1 }
 0x14b   :  { %v2381_v46 = vpop.f32.mrf.mxu0  ;;  %v2156_v6 = vmov 1966171168  }
 0x14c   :  { %v610_v14 = vadd.f32 %v609_v10, %v608_v8  ;;  %v618_v15 = vrot.slane %v617_v11, 2  ;;  %v635_v16 = vadd.f32 %v634_v12, %v633_v7  ;;  %v627_v19 = vrot.slane %v626_v13, 1  ;;  %1785 = vmatpush3.bf16.msra.mxu0 %v1917_v47  ;;  %v1583_v8 = vld [vmem:[%s2510_s8] ss:$0 sm:$0xff] }
 0x14d   :  { %v1774_v50 = vpop.f32.mrf.mxu0  ;;  %1786 = vmatprep.subr.bf16.mxu0 %v1919_v54  ;;  %v734_v7 = vunpack.c.l.s4 %v2156_v6  ;;  %v2391_v12 = vsub.s32 1, %v2278_v2 }
 0x14e   :  { %v611_v17 = vrot.slane %v610_v14, 1  ;;  %v619_v18 = vadd.f32 %v618_v15, %v617_v11  ;;  %v636_v21 = vrot.slane %v635_v16, 1  ;;  %v628_v28 = vadd.f32 %v627_v19, %v626_v13  ;;  %v589_v15 = vld [vmem:[%s2511_s9] sm:$0x1] }
 0x14f   :  { %v888_v52 = vpop.f32.mrf.mxu0  ;;  %v735_v9 = vunpack.c.0.s8 %v734_v7 }
 0x150   :  { %v620_v20 = vrot.slane %v619_v18, 1  ;;  %v612_v22 = vadd.f32 %v611_v17, %v610_v14  ;;  %v637_v29 = vadd.f32 %v636_v21, %v635_v16  ;;  %1787 = vmatpush3.bf16.msra.mxu0 %v1919_v54  ;;  %v2400_v17 = vsub.s32 0, %v2278_v2 }
 0x151   :  { %v1775_v56 = vpop.f32.mrf.mxu0  ;;  %1788 = vmatprep.subr.bf16.mxu0 %v1921_v57  ;;  %v2394_v14 = vsub.s32 %v735_v9, %v2278_v2  ;;  %v768_v21 = vsub.s32 3, %v2278_v2 }
 0x152   :  { %v621_v26 = vadd.f32 %v620_v20, %v619_v18 }
 0x154   :  { %v638_v31 = vsel %vm284_vm0, %v612_v22, %v621_v26  ;;  %1789 = vmatpush3.bf16.msra.mxu0 %v1921_v57 }
 0x155   :  { %v640_v33 = vsel %vm639_vm10, %v638_v31, %v628_v28  ;;  %1790 = vmatprep.subr.bf16.mxu0 %v1923_v61 }
 0x156   :  { %v642_v35 = vsel %vm641_vm11, %v640_v33, %v637_v29 }
 0x157   :  { %1768 = vmatmul.mubr.f32.vlgmr.msra.gmra.mxu1 %v642_v35 }
 0x158   :  { %1797 = vmatpush3.bf16.msra.mxu1 %v1908_v36  ;;  %1791 = vmatpush3.bf16.msra.mxu0 %v1923_v61 }
 0x159   :  { %1798 = vmatprep.subr.bf16.mxu1 %v1910_v39  ;;  %1816 = vmatprep.subr.bf16.mxu0 %v2384_v62 }
 0x15c   :  { %1799 = vmatpush3.bf16.msra.mxu1 %v1910_v39 }
 0x15d   :  { %1800 = vmatprep.subr.bf16.mxu1 %v1912_v41 }
 0x160   :  { %1801 = vmatpush3.bf16.msra.mxu1 %v1912_v41 }
 0x161   :  { %1802 = vmatprep.subr.bf16.mxu1 %v1914_v43 }
 0x164   :  { %1803 = vmatpush3.bf16.msra.mxu1 %v1914_v43 }
 0x165   :  { %1804 = vmatprep.subr.bf16.mxu1 %v1916_v45 }
 0x168   :  { %1805 = vmatpush3.bf16.msra.mxu1 %v1916_v45 }
 0x169   :  { %1806 = vmatprep.subr.bf16.mxu1 %v1918_v48 }
 0x16c   :  { %1807 = vmatpush3.bf16.msra.mxu1 %v1918_v48 }
 0x16d   :  { %1808 = vmatprep.subr.bf16.mxu1 %v1920_v55 }
 0x170   :  { %1809 = vmatpush3.bf16.msra.mxu1 %v1920_v55 }
 0x171   :  { %1810 = vmatprep.subr.bf16.mxu1 %v1922_v59 }
 0x174   :  { %1811 = vmatpush3.bf16.msra.mxu1 %v1922_v59 }
 0x175   :  { %1836 = vmatprep.subr.mxu1 %v2154_v60 }
 0x217   :  { %v709_v63 = vpop.f32.mrf.mxu1 }
 0x218   :  { %v713_v0 = vmul.f32 %v709_v63, %v709_v63 }
 0x219   :  { %v1769_v1 = vpop.f32.mrf.mxu1 }
 0x21a   :  { %v715_v3 = vrot.slane %v713_v0, 7 }
 0x21c   :  { %v717_v4 = vsub.f32 %v709_v63, %v715_v3 }
 0x21e   :  { %v718_v5 = vadd.f32 1e-05, %v717_v4 }
 0x220   :  { %1936 = vrsqrt.f32 %v718_v5 }
 0x22d   :  { %v1937_v10 = vpop.eup %1936 }
 0x22e   :  { %v726_v11 = vmul.f32 %v1937_v10, %v1583_v8 }
 0x230   :  { %v728_v13 = vrot.slane %v726_v11, 1  ;;  %v765_v18 = vrot.slane %v726_v11, %v2391_v12  ;;  %v769_v33 = vrot.slane %v726_v11, %v768_v21 }
 0x232   :  { %v730_v16 = vmul.f32 %v728_v13, %v709_v63  ;;  %v774_v28 = vmul.f32 %v765_v18, %v2360_v51  ;;  %v775_v29 = vmul.f32 %v765_v18, %v2370_v58  ;;  %v776_v42 = vmul.f32 %v769_v33, %v2358_v49 }
 0x233   :  { %v777_v43 = vmul.f32 %v769_v33, %v2362_v53  ;;  %v1589_v53 = vld [vmem:[%s2508_s6] ss:$0 sm:$0xff] }
 0x234   :  { %v731_v19 = vsub.f32 %v589_v15, %v730_v16  ;;  %v739_v20 = vrot.slane %v730_v16, %v2394_v14  ;;  %v886_v57 = vadd.f32 %v1589_v53, %v2381_v46  ;;  %v1315_v53 = vld [vmem:[#allocation13 + $0x30] sm:$0xff] }
 0x236   :  { %v746_v22 = vrot.slane %v739_v20, %v2394_v14  ;;  %v782_v26 = vrot.slane %v731_v19, %v2400_v17  ;;  %v894_v59 = vrot.slane %v886_v57, %v2400_v17  ;;  %v898_v5 = vrot.slane %v886_v57, %v2391_v12  ;;  %v1314_v57 = vld [vmem:[#allocation13 + $0x28] sm:$0xff] }
 0x238   :  { %v747_v31 = vcombine.high %v746_v22, %v746_v22  ;;  %v794_v35 = vadd.f32 %v782_v26, %v774_v28  ;;  %v795_v36 = vadd.f32 %v782_v26, %v775_v29 }
 0x23a   :  { %v749_v38 = vsub.f32 %v589_v15, %v747_v31  ;;  %v1584_v39 = vmul.f32 -1.442695, %v794_v35  ;;  %v1585_v40 = vmul.f32 -1.442695, %v795_v36 }
 0x23c   :  { %v788_v41 = vrot.slane %v749_v38, %v2400_v17  ;;  %1938 = vpow2.f32 %v1584_v39 }
 0x23d   :  { %1940 = vpow2.f32 %v1585_v40 }
 0x23e   :  { %v796_v51 = vadd.f32 %v788_v41, %v776_v42  ;;  %v797_v44 = vadd.f32 %v788_v41, %v777_v43  ;;  %v1927_v41 = vld [vmem:[#allocation10 + $0xa0] sm:$0xff]   ;;  %v1928_v42 = vld [vmem:[#allocation10 + $0x98] sm:$0xff]   ;;  %v1929_v43 = vld [vmem:[#allocation10 + $0x90] sm:$0xff]  }
 0x240   :  { %v1586_v58 = vmul.f32 -1.442695, %v796_v51  ;;  %v1587_v45 = vmul.f32 -1.442695, %v797_v44 }
 0x242   :  { %1942 = vpow2.f32 %v1586_v58 }
 0x243   :  { %1944 = vpow2.f32 %v1587_v45 }
 0x249   :  { %v1939_v47 = vpop.eup %1938 }
 0x24a   :  { %v1941_v48 = vpop.eup %1940  ;;  %v810_v50 = vadd.f32 1.0, %v1939_v47  ;;  %v1324_v47 = vld [vmem:[#allocation13 + $0x78] sm:$0xff] }
 0x24b   :  { %v811_v52 = vadd.f32 1.0, %v1941_v48  ;;  %v1323_v48 = vld [vmem:[#allocation13 + $0x70] sm:$0xff] }
 0x24c   :  { %1946 = vrcp.f32 %v810_v50  ;;  %v1322_v50 = vld [vmem:[#allocation13 + $0x68] sm:$0xff] }
 0x24d   :  { %1948 = vrcp.f32 %v811_v52  ;;  %v1321_v52 = vld [vmem:[#allocation13 + $0x60] sm:$0xff] }
 0x24f   :  { %v1943_v54 = vpop.eup %1942 }
 0x250   :  { %v1945_v55 = vpop.eup %1944  ;;  %v812_v56 = vadd.f32 1.0, %v1943_v54  ;;  %v1319_v54 = vld [vmem:[#allocation13 + $0x50] sm:$0xff] }
 0x251   :  { %v813_v49 = vadd.f32 1.0, %v1945_v55  ;;  %v1318_v55 = vld [vmem:[#allocation13 + $0x48] sm:$0xff] }
 0x252   :  { %1950 = vrcp.f32 %v812_v56  ;;  %v1317_v56 = vld [vmem:[#allocation13 + $0x40] sm:$0xff] }
 0x253   :  { %1952 = vrcp.f32 %v813_v49  ;;  %v1316_v49 = vld [vmem:[#allocation13 + $0x38] sm:$0xff] }
 0x259   :  { %v1947_v61 = vpop.eup %1946 }
 0x25a   :  { %v1949_v63 = vpop.eup %1948  ;;  %v822_v0 = vmul.f32 %v1947_v61, %v794_v35  ;;  %v1312_v61 = vld [vmem:[#allocation13 + $0x18] sm:$0xff] }
 0x25b   :  { %v823_v1 = vmul.f32 %v1949_v63, %v795_v36  ;;  %v1311_v63 = vld [vmem:[#allocation13 + $0x10] sm:$0xff] }
 0x25c   :  { %v903_v3 = vadd.f32 %v894_v59, %v822_v0  ;;  %v1310_v0 = vld [vmem:[#allocation13 + $0x8] sm:$0xff] }
 0x25d   :  { %v904_v4 = vadd.f32 %v894_v59, %v823_v1  ;;  %v1313_v59 = vld [vmem:[#allocation13 + $0x20] sm:$0xff] }
 0x25e   :  { %v932_v15 = vrot.slane %v903_v3, 7  ;;  %v1159_v20 = vrot.slane %v903_v3, 1  ;;  %v1309_v1 = vld [vmem:[#allocation13] sm:$0xff] }
 0x25f   :  { %v1951_v6 = vpop.eup %1950  ;;  %v907_v7 = vpack.c.bf16 %v904_v4, %v903_v3  ;;  %v933_v46 = vrot.slane %v904_v4, 7  ;;  %v1160_v22 = vrot.slane %v904_v4, 1 }
 0x260   :  { %v1953_v8 = vpop.eup %1952  ;;  %v824_v9 = vmul.f32 %v1951_v6, %v796_v51  ;;  %v1931_v51 = vld [vmem:[#allocation10 + $0x80] sm:$0xff]  }
 0x261   :  { %v825_v10 = vmul.f32 %v1953_v8, %v797_v44  ;;  %1812 = vmatprep.mubr.bf16.mxu1 %v907_v7  ;;  %v934_v29 = vsel %vm284_vm0, %v932_v15, %v933_v46  ;;  %v1161_v39 = vsel %vm453_vm1, %v1159_v20, %v1160_v22 }
 0x262   :  { %v905_v11 = vadd.f32 %v898_v5, %v824_v9 }
 0x263   :  { %v906_v13 = vadd.f32 %v898_v5, %v825_v10 }
 0x264   :  { %v935_v16 = vrot.slane %v905_v11, 7  ;;  %v1162_v18 = vrot.slane %v905_v11, 1 }
 0x265   :  { %v927_v19 = vrot.slane %v906_v13, 7  ;;  %v908_v26 = vpack.c.bf16 %v906_v13, %v905_v11  ;;  %v1164_v44 = vrot.slane %v906_v13, 1 }
 0x266   :  { %v936_v28 = vsel %vm284_vm0, %v933_v46, %v935_v16  ;;  %v1163_v35 = vsel %vm453_vm1, %v1160_v22, %v1162_v18  ;;  %v1627_v46 = vld [vmem:[%s2513_s11] ss:$0 sm:$0xff] }
 0x267   :  { %1813 = vmatmul.mubr.bf16.vlgmr.msra.gmra.mxu1 %v908_v26  ;;  %v942_v31 = vsel %vm284_vm0, %v927_v19, %v932_v15  ;;  %v937_v33 = vsel %vm284_vm0, %v935_v16, %v927_v19  ;;  %v1622_v40 = vpack.c.bf16 %v1163_v35, %v1161_v39  ;;  %v1171_v58 = vsel %vm453_vm1, %v1164_v44, %v1159_v20 }
 0x268   :  { %v1600_v36 = vpack.c.bf16 %v934_v29, %v942_v31  ;;  %v1603_v38 = vpack.c.bf16 %v937_v33, %v936_v28  ;;  %1868 = vmatprep.mubr.msk.f32.mxu1 %vm2155_vm7, %v2154_v60  ;;  %1837 = vmatpush3.msra.mxu1 %v1324_v47 }
 0x269   :  { %1838 = vmatprep.subr.mxu1 %v2154_v60 }
 0x26a   :  { %1792 = vmatprep.mubr.msk.bf16.mxu0 %vm1599_vm13, %v1600_v36  ;;  %1839 = vmatpush3.msra.mxu1 %v1323_v48 }
 0x26b   :  { %1793 = vmatmul.mubr.msk.bf16.vlgmr.msra.gmra.mxu0 %vm1602_vm14, %v1603_v38  ;;  %1840 = vmatprep.subr.mxu1 %v2154_v60 }
 0x26c   :  { %1817 = vmatpush3.bf16.msra.mxu0 %v2384_v62  ;;  %1832 = vmatprep.mubr.msk.bf16.mxu0 %vm1621_vm15, %v1622_v40  ;;  %v1165_v62 = vsel %vm453_vm1, %v1162_v18, %v1164_v44 }
 0x26d   :  { %1818 = vmatprep.subr.bf16.mxu0 %v1925_v23  ;;  %v1625_v45 = vpack.c.bf16 %v1171_v58, %v1165_v62  ;;  %1841 = vmatpush3.msra.mxu1 %v1322_v50 }
 0x26e   :  { %1842 = vmatprep.subr.mxu1 %v2154_v60 }
 0x26f   :  { %1843 = vmatpush3.msra.mxu1 %v1321_v52 }
 0x270   :  { %1819 = vmatpush3.bf16.msra.mxu0 %v1925_v23  ;;  %1844 = vmatprep.subr.mxu1 %v2154_v60 }
 0x271   :  { %1820 = vmatprep.subr.bf16.mxu0 %v1926_v25  ;;  %1845 = vmatpush3.msra.mxu1 %v1320_v24 }
 0x272   :  { %1846 = vmatprep.subr.mxu1 %v2154_v60 }
 0x273   :  { %1847 = vmatpush3.msra.mxu1 %v1319_v54 }
 0x274   :  { %1821 = vmatpush3.bf16.msra.mxu0 %v1926_v25  ;;  %1848 = vmatprep.subr.mxu1 %v2154_v60 }
 0x275   :  { %1822 = vmatprep.subr.bf16.mxu0 %v1927_v41  ;;  %1849 = vmatpush3.msra.mxu1 %v1318_v55 }
 0x276   :  { %1850 = vmatprep.subr.mxu1 %v2154_v60 }
 0x277   :  { %1851 = vmatpush3.msra.mxu1 %v1317_v56 }
 0x278   :  { %1823 = vmatpush3.bf16.msra.mxu0 %v1927_v41  ;;  %1852 = vmatprep.subr.mxu1 %v2154_v60 }
 0x279   :  { %1824 = vmatprep.subr.bf16.mxu0 %v1928_v42  ;;  %1853 = vmatpush3.msra.mxu1 %v1316_v49 }
 0x27a   :  { %1854 = vmatprep.subr.mxu1 %v2154_v60 }
 0x27b   :  { %1855 = vmatpush3.msra.mxu1 %v1315_v53 }
 0x27c   :  { %1825 = vmatpush3.bf16.msra.mxu0 %v1928_v42  ;;  %1856 = vmatprep.subr.mxu1 %v2154_v60 }
 0x27d   :  { %1826 = vmatprep.subr.bf16.mxu0 %v1929_v43  ;;  %1857 = vmatpush3.msra.mxu1 %v1314_v57 }
 0x27e   :  { %1858 = vmatprep.subr.mxu1 %v2154_v60 }
 0x27f   :  { %1859 = vmatpush3.msra.mxu1 %v1313_v59 }
 0x280   :  { %1827 = vmatpush3.bf16.msra.mxu0 %v1929_v43  ;;  %1860 = vmatprep.subr.mxu1 %v2154_v60 }
 0x281   :  { %1828 = vmatprep.subr.bf16.mxu0 %v1930_v32  ;;  %1861 = vmatpush3.msra.mxu1 %v1312_v61 }
 0x282   :  { %1862 = vmatprep.subr.mxu1 %v2154_v60 }
 0x283   :  { %1863 = vmatpush3.msra.mxu1 %v1311_v63 }
 0x284   :  { %1829 = vmatpush3.bf16.msra.mxu0 %v1930_v32  ;;  %1864 = vmatprep.subr.mxu1 %v2154_v60 }
 0x285   :  { %1830 = vmatprep.subr.bf16.mxu0 %v1931_v51  ;;  %1865 = vmatpush3.msra.mxu1 %v1310_v0 }
 0x286   :  { %1866 = vmatprep.subr.mxu1 %v2154_v60 }
 0x287   :  { %1867 = vmatpush3.msra.mxu1 %v1309_v1 }
 0x288   :  { %1831 = vmatpush3.bf16.msra.mxu0 %v1931_v51 }
 0x28b   :  { %1833 = vmatmul.mubr.msk.bf16.vlgmr.msra.gmra.mxu0 %vm1624_vm2, %v1625_v45 }
 0x327   :  { %v1814_v5 = vpop.f32.mrf.mxu1 }
 0x329   :  { %v1144_v7 = vpop.f32.mrf.mxu1 }
 0x32b   :  { %v1794_v3 = vpop.f32.mrf.mxu0  ;;  %v1815_v10 = vpop.f32.mrf.mxu1 }
 0x32c   :  { %v1153_v9 = vadd.f32 %v1814_v5, %v1794_v3 }
 0x32d   :  { %v1047_v4 = vpop.f32.mrf.mxu0  ;;  %v1147_v60 = vpop.f32.mrf.mxu1 }
 0x32e   :  { %v1145_v13 = vadd.f32 %v1144_v7, %v1047_v4 }
 0x32f   :  { %v1795_v6 = vpop.f32.mrf.mxu0 }
 0x330   :  { %v1156_v18 = vadd.f32 %v1815_v10, %v1795_v6 }
 0x331   :  { %v1050_v8 = vpop.f32.mrf.mxu0 }
 0x332   :  { %v1148_v22 = vadd.f32 %v1147_v60, %v1050_v8  ;;  %v1308_v60 = vld [vmem:[%s2515_s13] sm:$0x1] }
 0x34b   :  { %v1834_v11 = vpop.f32.mrf.mxu0 }
 0x34c   :  { %v1294_v15 = vadd.f32 %v1834_v11, %v1153_v9 }
 0x34d   :  { %v1277_v16 = vpop.f32.mrf.mxu0 }
 0x34e   :  { %v1292_v19 = vadd.f32 %v1277_v16, %v1145_v13  ;;  %v2461_v26 = vadd.f32 %v1627_v46, %v1294_v15 }
 0x34f   :  { %v1835_v20 = vpop.f32.mrf.mxu0 }
 0x350   :  { %v1295_v28 = vadd.f32 %v1835_v20, %v1156_v18  ;;  %v1303_v29 = vadd.f32 %v1627_v46, %v1292_v19  ;;  %v1348_v36 = vmul.f32 %v2461_v26, %v2461_v26 }
 0x351   :  { %v1280_v31 = vpop.f32.mrf.mxu0 }
 0x352   :  { %v2463_v33 = vadd.f32 %v1627_v46, %v1295_v28  ;;  %v1293_v35 = vadd.f32 %v1280_v31, %v1148_v22  ;;  %v1332_v40 = vmul.f32 %v1303_v29, %v1303_v29 }
 0x354   :  { %v1341_v38 = vadd.f32 %v2463_v33, %v2461_v26  ;;  %v1349_v39 = vmul.f32 %v2463_v33, %v2463_v33  ;;  %v1304_v23 = vadd.f32 %v1627_v46, %v1293_v35  ;;  %v1628_v46 = vld [vmem:[%s2514_s12] ss:$0 sm:$0xff] }
 0x356   :  { %v1342_v25 = vrot.slane %v1341_v38, 4  ;;  %v1350_v41 = vadd.f32 %v1349_v39, %v1348_v36  ;;  %v1325_v42 = vadd.f32 %v1304_v23, %v1303_v29  ;;  %v1333_v43 = vmul.f32 %v1304_v23, %v1304_v23 }
 0x358   :  { %v1343_v32 = vadd.f32 %v1342_v25, %v1341_v38  ;;  %v1351_v51 = vrot.slane %v1350_v41, 4  ;;  %v1326_v44 = vrot.slane %v1325_v42, 4  ;;  %v1334_v62 = vadd.f32 %v1333_v43, %v1332_v40 }
 0x35a   :  { %v1344_v58 = vrot.slane %v1343_v32, 2  ;;  %v1352_v45 = vadd.f32 %v1351_v51, %v1350_v41  ;;  %v1327_v47 = vadd.f32 %v1326_v44, %v1325_v42  ;;  %v1335_v48 = vrot.slane %v1334_v62, 4 }
 0x35c   :  { %v1328_v50 = vrot.slane %v1327_v47, 2  ;;  %v1336_v52 = vadd.f32 %v1335_v48, %v1334_v62  ;;  %v1353_v24 = vrot.slane %v1352_v45, 2  ;;  %v1345_v54 = vadd.f32 %v1344_v58, %v1343_v32 }
 0x35e   :  { %v1329_v55 = vadd.f32 %v1328_v50, %v1327_v47  ;;  %v1337_v56 = vrot.slane %v1336_v52, 2  ;;  %v1354_v49 = vadd.f32 %v1353_v24, %v1352_v45  ;;  %v1346_v59 = vrot.slane %v1345_v54, 1 }
 0x360   :  { %v1330_v53 = vrot.slane %v1329_v55, 1  ;;  %v1338_v57 = vadd.f32 %v1337_v56, %v1336_v52  ;;  %v1355_v63 = vrot.slane %v1354_v49, 1  ;;  %v1347_v3 = vadd.f32 %v1346_v59, %v1345_v54 }
 0x362   :  { %v1339_v61 = vrot.slane %v1338_v57, 1  ;;  %v1331_v0 = vadd.f32 %v1330_v53, %v1329_v55  ;;  %v1356_v4 = vadd.f32 %v1355_v63, %v1354_v49 }
 0x364   :  { %v1340_v1 = vadd.f32 %v1339_v61, %v1338_v57 }
 0x366   :  { %v1357_v5 = vsel %vm284_vm0, %v1331_v0, %v1340_v1 }
 0x367   :  { %v1358_v6 = vsel %vm639_vm10, %v1357_v5, %v1347_v3 }
 0x368   :  { %v1359_v7 = vsel %vm641_vm11, %v1358_v6, %v1356_v4 }
 0x369   :  { %1869 = vmatmul.mubr.f32.vlgmr.msra.gmra.mxu1 %v1359_v7 }
 0x429   :  { %v1426_v8 = vpop.f32.mrf.mxu1 }
 0x42a   :  { %v1430_v9 = vmul.f32 %v1426_v8, %v1426_v8 }
 0x42b   :  { %v1870_v10 = vpop.f32.mrf.mxu1 }
 0x42c   :  { %v1432_v11 = vrot.slane %v1430_v9, 7 }
 0x42e   :  { %v1434_v13 = vsub.f32 %v1426_v8, %v1432_v11 }
 0x430   :  { %v1435_v15 = vadd.f32 1e-05, %v1434_v13 }
 0x432   :  { %1954 = vrsqrt.f32 %v1435_v15 }
 0x43f   :  { %v1955_v16 = vpop.eup %1954 }
 0x440   :  { %v1443_v18 = vmul.f32 %v1955_v16, %v1628_v46 }
 0x442   :  { %v1445_v19 = vrot.slane %v1443_v18, 1  ;;  %v1470_v22 = vrot.slane %v1443_v18, %v2391_v12  ;;  %v1474_v25 = vrot.slane %v1443_v18, %v768_v21 }
 0x444   :  { %v1447_v20 = vmul.f32 %v1445_v19, %v1426_v8  ;;  %v1479_v36 = vmul.f32 %v1470_v22, %v1303_v29  ;;  %v1480_v38 = vmul.f32 %v1470_v22, %v1304_v23  ;;  %v1481_v12 = vmul.f32 %v1474_v25, %v2461_v26 }
 0x445   :  { %v1482_v44 = vmul.f32 %v1474_v25, %v2463_v33 }
 0x446   :  { %v1448_v28 = vsub.f32 %v1308_v60, %v1447_v20  ;;  %v1456_v31 = vrot.slane %v1447_v20, %v2394_v14 }
 0x448   :  { %v1463_v35 = vrot.slane %v1456_v31, %v2394_v14  ;;  %v1487_v39 = vrot.slane %v1448_v28, %v2400_v17 }
 0x44a   :  { %v1464_v40 = vcombine.high %v1463_v35, %v1463_v35  ;;  %v1499_v41 = vadd.f32 %v1487_v39, %v1479_v36  ;;  %v1500_v42 = vadd.f32 %v1487_v39, %v1480_v38 }
 0x44c   :  { %v1466_v43 = vsub.f32 %v1308_v60, %v1464_v40  ;;  %v1629_v32 = vmul.f32 -1.442695, %v1499_v41  ;;  %v1630_v51 = vmul.f32 -1.442695, %v1500_v42 }
 0x44e   :  { %v1493_v62 = vrot.slane %v1466_v43, %v2400_v17  ;;  %1956 = vpow2.f32 %v1629_v32  ;;  %v1569_v17 = vld [vmem:[%s2517_s15] ss:$0 sm:$0xff]  ;;  %s2112_s15 = scalar_lea.vmem %s1545_s21, 512 }
 0x44f   :  { %1958 = vpow2.f32 %v1630_v51  ;;  %v274_v54 = vadd.f32 %v1569_v17, %v2347_v27  ;;  %v275_v56 = vadd.f32 %v1569_v17, %v2349_v30  ;;  %v276_v63 = vadd.f32 %v1569_v17, %v2351_v34  ;;  %p2113_p7 = scmp.ne.s32.totalorder %s1545_s21, %s2112_s15  ;;  %p2118_p9 = scmp.lt.s32.totalorder %s2112_s15, %s2112_s15 }
 0x450   :  { %v1501_v14 = vadd.f32 %v1493_v62, %v1481_v12  ;;  %v1502_v29 = vadd.f32 %v1493_v62, %v1482_v44  ;;  %v277_v1 = vadd.f32 %v1569_v17, %v2353_v37 }
 0x451   :  { %p2119_p10 = por %p2118_p9, %p2117_p8 }
 0x452   :  { %v1631_v23 = vmul.f32 -1.442695, %v1501_v14  ;;  %v1632_v58 = vmul.f32 -1.442695, %v1502_v29 }
 0x453   :  { %p2120_p11 = pnand %p2119_p10, %p2113_p7 }
 0x454   :  { %1960 = vpow2.f32 %v1631_v23 }
 0x455   :  { %1962 = vpow2.f32 %v1632_v58 }
 0x45b   :  { %v1957_v2 = vpop.eup %1956 }
 0x45c   :  { %v1959_v21 = vpop.eup %1958  ;;  %v1515_v45 = vadd.f32 1.0, %v1957_v2 }
 0x45d   :  { %v1516_v47 = vadd.f32 1.0, %v1959_v21 }
 0x45e   :  { %1964 = vrcp.f32 %v1515_v45 }
 0x45f   :  { %1966 = vrcp.f32 %v1516_v47 }
 0x461   :  { %v1961_v48 = vpop.eup %1960 }
 0x462   :  { %v1963_v26 = vpop.eup %1962  ;;  %v1517_v50 = vadd.f32 1.0, %v1961_v48 }
 0x463   :  { %v1518_v33 = vadd.f32 1.0, %v1963_v26 }
 0x464   :  { %1968 = vrcp.f32 %v1517_v50 }
 0x465   :  { %1970 = vrcp.f32 %v1518_v33 }
 0x46b   :  { %v1965_v52 = vpop.eup %1964 }
 0x46c   :  { %v1967_v24 = vpop.eup %1966  ;;  %v1527_v55 = vmul.f32 %v1965_v52, %v1499_v41 }
 0x46d   :  { %v1528_v49 = vmul.f32 %v1967_v24, %v1500_v42 }
 0x46e   :  { %v1531_v53 = vadd.f32 %v1527_v55, %v274_v54 }
 0x46f   :  { %v1532_v57 = vadd.f32 %v1528_v49, %v275_v56 }
 0x470   :  { %1535 = vst [vmem:[#allocation14] sm:$0xff] %v1531_v53 }
 0x471   :  { %v1969_v59 = vpop.eup %1968  ;;  %1536 = vst [vmem:[#allocation14 + $0x8] sm:$0xff] %v1532_v57 }
 0x472   :  { %v1971_v61 = vpop.eup %1970  ;;  %v1529_v0 = vmul.f32 %v1969_v59, %v1501_v14 }
 0x473   :  { %v1530_v3 = vmul.f32 %v1971_v61, %v1502_v29 }
 0x474   :  { %v1533_v4 = vadd.f32 %v1529_v0, %v276_v63 }
 0x475   :  { %v1534_v27 = vadd.f32 %v1530_v3, %v277_v1 }
 0x476   :  { %1537 = vst [vmem:[#allocation14 + $0x10] sm:$0xff] %v1533_v4 }
 0x477   :  { %1538 = vst [vmem:[#allocation14 + $0x18] sm:$0xff] %v1534_v27 }
 0x478   :  { %2123 = shalt.err (!%p2120_p11)
}
 0x479   :  { %1550 = dma.vmem_to_hbm [thread:$0]  %s1545_s21, 512, %s2518_s16, [#allocation4], %s2145_s0, %s2145_s0, %s2146_s17  }
 0x47a   :  { %2140 = dma.done.wait [#allocation4], 512  }
 0x47b   :  { %2141 = vsyncadd [#allocation4], 4294966784 }
 0x47c   :  { %1554 = vsyncpa [#allocation3], 1 }
 0x47d   :  { %1555 = vsyncpa [#allocation6], 1 }
 0x47e   :  { %1556 = vsyncpa [#allocation9], 1 }
 0x47f   :  { %1557 = vsyncpa [#allocation12], 1 }
 0x480   :  { %1558 = vsyncpa [#allocation4], 1 }

</bundles_post_ra>
